<compile_context>
chip_gen: v5e
topology: v5e:2x2
jax: 0.10.0
libtpu: 0.0.40
codegen_flags: <defaults>
</compile_context>

<pallas_src>
import numpy as np
import jax
import jax.numpy as jnp
from jax.experimental import pallas as pl
from jax.experimental.pallas import tpu as pltpu

SIGNAL_DIM = 8
N_FILTERS = 2
N_LAYERS = 6
INNER_DIM = 32
KERNEL_SIZE = 3
HIDDEN_DIM = 16                 # attention hidden dim
FEAT = 2 * SIGNAL_DIM           # 16
CL = N_FILTERS * INNER_DIM      # 64 (channel-major flattened conv state)
HL = HIDDEN_DIM * INNER_DIM     # 512 (attention hidden state, per position)


def spectrum_kernel(inp_t_ref, w1t_ref, b1_ref, wmid_ref, bmid_ref,
                    wabig_ref, bacol_ref, uabig_ref, ubcol_ref,
                    wout_ref, bout_ref, out_ref):
    # Layout: activations are (C*L = 64 sublanes, TB batch lanes).
    L = INNER_DIM

    # in_layer fused with conv layer 1 (+BN1): one (64,16)@(16,TB) MXU matmul.
    x = jnp.dot(w1t_ref[...], inp_t_ref[...], preferred_element_type=jnp.float32)
    x = jnp.maximum(x + b1_ref[...], 0.0)

    # conv layers 2..6 as banded 64x64 MXU matmuls (BN folded), bias + ReLU.
    # TODO(synk): Dropout(0.5) is identity in eval mode; training-mode dropout
    # would need pltpu.prng_* based masking.
    for n in range(N_LAYERS - 1):
        x = jnp.dot(wmid_ref[n], x, preferred_element_type=jnp.float32)
        x = jnp.maximum(x + bmid_ref[n], 0.0)

    # Channel planes: aligned sublane slices (L on sublanes, batch on lanes).
    x0 = x[0 * L:1 * L, :]
    x1 = x[1 * L:2 * L, :]

    # Attention over the channel axis, lifted onto the MXU via host-folded
    # block-diagonal matrices:
    #   S = tanh(Wa_big @ x + ba_col)   (H*L, TB)
    #   U = Ua_big @ S + ub_col         (C*L, TB)
    s = jnp.tanh(jnp.dot(wabig_ref[...], x, preferred_element_type=jnp.float32)
                 + bacol_ref[...])
    u = jnp.dot(uabig_ref[...], s, preferred_element_type=jnp.float32) + ubcol_ref[...]

    # 2-class softmax == exact sigmoid blend (one EUP op, no approx recip).
    w1 = jax.nn.sigmoid(u[L:2 * L, :] - u[0:L, :])
    att = x0 + w1 * (x1 - x0)                            # (L, TB)

    # out_layer (transposed): (16,32)@(32,TB) + (16,1) -> lane-dense store.
    out = jnp.dot(wout_ref[...], att, preferred_element_type=jnp.float32) + bout_ref[...]
    out_ref[...] = out.astype(out_ref.dtype)


def _round_up(x, m):
    return ((x + m - 1) // m) * m


def _choose_tb(B):
    """Lane-tile of the batch.

    <=256 lanes keeps the attention working set comfortable (no vreg spill);
    128-lane tiles for small/medium batches also give >=2 grid steps so the
    "parallel" axis shards across v7x's two TensorCores.
    """
    b128 = _round_up(max(B, 1), 128)
    return 256 if b128 >= 512 else 128


def spectrum_forward(inp, params, tb=None):
    B = inp.shape[0]
    if tb is None:
        tb = _choose_tb(B)
    B_pad = _round_up(max(B, tb), tb)
    grid = (B_pad // tb,)

    # Batch on lanes.  (Padded lanes flow through tanh/sigmoid unmasked; all
    # intermediates are bounded, and padded rows are sliced off below.)
    inp_t = jnp.transpose(inp.astype(jnp.float32))       # (16, B)
    if B_pad != B:
        inp_t = jnp.pad(inp_t, ((0, 0), (0, B_pad - B)))

    (w1t, b1, wmid, bmid, wabig, bacol, uabig, ubcol, wout, bout) = params

    def resident(a):   # full-array block, VMEM-resident across the grid
        return pl.BlockSpec(a.shape, lambda i, _nd=a.ndim: (0,) * _nd)

    out_t = pl.pallas_call(
        spectrum_kernel,
        out_shape=jax.ShapeDtypeStruct((FEAT, B_pad), jnp.float32),
        grid=grid,
        in_specs=[
            pl.BlockSpec((FEAT, tb), lambda i: (0, i)),   # input batch tile
            resident(w1t),                                # (64, 16) fused in+conv1
            resident(b1),                                 # (64, 1)
            resident(wmid),                               # (5, 64, 64) banded convs
            resident(bmid),                               # (5, 64, 1)
            resident(wabig),                              # (512, 64) attention Wa
            resident(bacol),                              # (512, 1)
            resident(uabig),                              # (64, 512) attention Ua
            resident(ubcol),                              # (64, 1)
            resident(wout),                               # (16, 32)
            resident(bout),                               # (16, 1)
        ],
        out_specs=pl.BlockSpec((FEAT, tb), lambda i: (0, i)),
        compiler_params=pltpu.CompilerParams(
            dimension_semantics=("parallel",)),
    )(inp_t, w1t, b1, wmid, bmid, wabig, bacol, uabig, ubcol, wout, bout)

    return jnp.transpose(out_t)[:B]


def init_params(key):
    ks = jax.random.split(key, 10)

    def unif(k, shape, fan_in):
        b = 1.0 / (fan_in ** 0.5)
        return np.asarray(jax.random.uniform(k, shape, jnp.float32, -b, b))

    L = INNER_DIM
    # in_layer: Linear(16 -> 64, bias=False); PyTorch weight (64, 16)
    win = unif(ks[0], (CL, FEAT), FEAT)
    # conv weights: (n_layers, C_out, C_in, K)
    convw = unif(ks[1], (N_LAYERS, N_FILTERS, N_FILTERS, KERNEL_SIZE),
                 N_FILTERS * KERNEL_SIZE)
    # BatchNorm1d (eval): fold gamma/beta/running stats into scale/bias
    gamma = 1.0 + 0.1 * np.asarray(jax.random.normal(ks[2], (N_LAYERS, N_FILTERS), jnp.float32))
    beta = 0.1 * np.asarray(jax.random.normal(ks[3], (N_LAYERS, N_FILTERS), jnp.float32))
    running_mean = np.zeros((N_LAYERS, N_FILTERS), np.float32)
    running_var = np.ones((N_LAYERS, N_FILTERS), np.float32)
    eps = 1e-5
    bn_scale = (gamma / np.sqrt(running_var + eps)).astype(np.float32)
    bn_bias = (beta - running_mean * bn_scale).astype(np.float32)

    # Attention: Wa = Linear(2 -> 16), Ua = Linear(16 -> 2)
    wa = unif(ks[4], (HIDDEN_DIM, N_FILTERS), N_FILTERS)
    ba = unif(ks[5], (HIDDEN_DIM,), N_FILTERS)
    ua = unif(ks[6], (N_FILTERS, HIDDEN_DIM), HIDDEN_DIM)
    ub = unif(ks[7], (N_FILTERS,), HIDDEN_DIM)
    # out_layer sized Linear(inner_dim -> 2*signal_dim) (see NOTE at top)
    wout = unif(ks[8], (FEAT, INNER_DIM), INNER_DIM)
    bout = unif(ks[9], (FEAT,), INNER_DIM)

    # ---- host-side folding: conv+BN -> transposed banded 64x64 matrices ----
    # band_t[n, co*L+lo, ci*L+li] = convw[n,co,ci,dk]*bn_scale[n,co], li = lo+dk-1
    pad = KERNEL_SIZE // 2
    band_t = np.zeros((N_LAYERS, CL, CL), np.float32)
    for n in range(N_LAYERS):
        for co in range(N_FILTERS):
            for ci in range(N_FILTERS):
                for dk in range(KERNEL_SIZE):
                    w = convw[n, co, ci, dk] * bn_scale[n, co]
                    for lo in range(L):
                        li = lo + dk - pad
                        if 0 <= li < L:
                            band_t[n, co * L + lo, ci * L + li] = w
    bias_cols = np.repeat(bn_bias, L, axis=1)[:, :, None].astype(np.float32)  # (6,64,1)

    # fuse bias-free in_layer with conv layer 1:  z1^T = (band1 @ Win) @ inp^T
    w1t = (band_t[0] @ win).astype(np.float32)            # (64, 16)

    # ---- host-side folding: attention Wa/Ua -> block-diagonal MXU matrices --
    # S[h*L+l] = sum_c Wa[h,c] * x[c*L+l]   ;  U[c*L+l] = sum_h Ua[c,h] * S[h*L+l]
    wa_big = np.zeros((HL, CL), np.float32)
    ua_big = np.zeros((CL, HL), np.float32)
    idx = np.arange(L)
    for h in range(HIDDEN_DIM):
        for c in range(N_FILTERS):
            wa_big[h * L + idx, c * L + idx] = wa[h, c]
            ua_big[c * L + idx, h * L + idx] = ua[c, h]
    ba_col = np.repeat(ba, L)[:, None].astype(np.float32)   # (512, 1)
    ub_col = np.repeat(ub, L)[:, None].astype(np.float32)   # (64, 1)

    kernel_params = (
        jnp.asarray(w1t, jnp.float32),                    # (64, 16)
        jnp.asarray(bias_cols[0], jnp.float32),           # (64, 1)
        jnp.asarray(band_t[1:], jnp.float32),             # (5, 64, 64)
        jnp.asarray(bias_cols[1:], jnp.float32),          # (5, 64, 1)
        jnp.asarray(wa_big, jnp.float32),                 # (512, 64)
        jnp.asarray(ba_col, jnp.float32),                 # (512, 1)
        jnp.asarray(ua_big, jnp.float32),                 # (64, 512)
        jnp.asarray(ub_col, jnp.float32),                 # (64, 1)
        jnp.asarray(wout, jnp.float32),                   # (16, 32)
        jnp.asarray(bout.reshape(-1, 1), jnp.float32),    # (16, 1)
    )
    raw_params = dict(win=jnp.asarray(win), convw=jnp.asarray(convw),
                      bn_scale=jnp.asarray(bn_scale), bn_bias=jnp.asarray(bn_bias),
                      wa=jnp.asarray(wa), ba=jnp.asarray(ba),
                      ua=jnp.asarray(ua), ub=jnp.asarray(ub),
                      wout=jnp.asarray(wout), bout=jnp.asarray(bout))
    return kernel_params, raw_params


def ref_forward(inp, raw):
    """Pure-JAX reference of the (reinterpreted) SpectrumModule forward."""
    L = INNER_DIM
    h = inp @ raw["win"].T                                   # (B, 64)
    x = h.reshape(-1, N_FILTERS, L)                          # (B, C, L)
    for n in range(N_LAYERS):
        xp = jnp.pad(x, ((0, 0), (0, 0), (1, 1)))
        taps = jnp.stack([xp[:, :, dk:dk + L] for dk in range(KERNEL_SIZE)], axis=-1)
        x = jnp.einsum("oik,bilk->bol", raw["convw"][n], taps)
        x = x * raw["bn_scale"][n][None, :, None] + raw["bn_bias"][n][None, :, None]
        x = jnp.maximum(x, 0.0)
    xt = jnp.transpose(x, (0, 2, 1))                         # (B, L, C)
    scores = jnp.tanh(xt @ raw["wa"].T + raw["ba"])          # (B, L, H)
    logits = scores @ raw["ua"].T + raw["ub"]                # (B, L, C)
    attw = jax.nn.softmax(logits, axis=-1)
    att = jnp.sum(attw * xt, axis=-1)                        # (B, L)
    return att @ raw["wout"].T + raw["bout"]                 # (B, 16)


if __name__ == "__main__":
    key = jax.random.PRNGKey(0)
    kp, kx = jax.random.split(key)
    params, raw = init_params(kp)

    # Small deterministic test (single tile).
    B = 2
    inp = jax.random.normal(kx, (B, FEAT), jnp.float32)
    out = spectrum_forward(inp, params)
    jax.block_until_ready(out)
    assert out.shape == (B, FEAT) and out.dtype == jnp.float32
    ref = ref_forward(inp, raw)
    err = float(jnp.max(jnp.abs(out - ref)))
    assert err < 1e-2, f"max abs err vs reference: {err}"

    # Exercise the multi-tile grid + padded-batch path as well.
    B2 = 600
    inp2 = jax.random.normal(jax.random.PRNGKey(1), (B2, FEAT), jnp.float32)
    out2 = spectrum_forward(inp2, params)
    jax.block_until_ready(out2)
    err2 = float(jnp.max(jnp.abs(out2 - ref_forward(inp2, raw))))
    assert err2 < 1e-2, f"max abs err vs reference (B={B2}): {err2}"

    print("KERNEL_OK")
</pallas_src>

<mosaic_0001>
module attributes {stable_mosaic.version = 11 : i64} {
  func.func @spectrum_kernel(%arg0: i32, %arg1: memref<16x128xf32, #tpu.memory_space<vmem>>, %arg2: memref<64x16xf32, #tpu.memory_space<vmem>>, %arg3: memref<64x1xf32, #tpu.memory_space<vmem>>, %arg4: memref<5x64x64xf32, #tpu.memory_space<vmem>>, %arg5: memref<5x64x1xf32, #tpu.memory_space<vmem>>, %arg6: memref<512x64xf32, #tpu.memory_space<vmem>>, %arg7: memref<512x1xf32, #tpu.memory_space<vmem>>, %arg8: memref<64x512xf32, #tpu.memory_space<vmem>>, %arg9: memref<64x1xf32, #tpu.memory_space<vmem>>, %arg10: memref<16x32xf32, #tpu.memory_space<vmem>>, %arg11: memref<16x1xf32, #tpu.memory_space<vmem>>, %arg12: memref<16x128xf32, #tpu.memory_space<vmem>>) attributes {dimension_semantics = [#tpu.dimension_semantics<parallel>], iteration_bounds = array<i64: 1>, scalar_prefetch = 0 : i64, scratch_operands = 0 : i64, tpu.core_type = #tpu.core_type<tc>, window_params = [{transform_indices = @transform_0, window_bounds = array<i64: 16, 128>}, {pipeline_mode = #tpu.pipeline_mode<synchronous>, transform_indices = @transform_1, window_bounds = array<i64: 64, 16>}, {pipeline_mode = #tpu.pipeline_mode<synchronous>, transform_indices = @transform_2, window_bounds = array<i64: 64, 1>}, {pipeline_mode = #tpu.pipeline_mode<synchronous>, transform_indices = @transform_3, window_bounds = array<i64: 5, 64, 64>}, {pipeline_mode = #tpu.pipeline_mode<synchronous>, transform_indices = @transform_4, window_bounds = array<i64: 5, 64, 1>}, {pipeline_mode = #tpu.pipeline_mode<synchronous>, transform_indices = @transform_5, window_bounds = array<i64: 512, 64>}, {pipeline_mode = #tpu.pipeline_mode<synchronous>, transform_indices = @transform_6, window_bounds = array<i64: 512, 1>}, {pipeline_mode = #tpu.pipeline_mode<synchronous>, transform_indices = @transform_7, window_bounds = array<i64: 64, 512>}, {pipeline_mode = #tpu.pipeline_mode<synchronous>, transform_indices = @transform_8, window_bounds = array<i64: 64, 1>}, {pipeline_mode = #tpu.pipeline_mode<synchronous>, transform_indices = @transform_9, window_bounds = array<i64: 16, 32>}, {pipeline_mode = #tpu.pipeline_mode<synchronous>, transform_indices = @transform_10, window_bounds = array<i64: 16, 1>}, {transform_indices = @transform_11, window_bounds = array<i64: 16, 128>}]} {
    %c0 = arith.constant 0 : index
    %c0_0 = arith.constant 0 : index
    %0 = vector.load %arg2[%c0, %c0_0] : memref<64x16xf32, #tpu.memory_space<vmem>>, vector<64x16xf32>
    %c0_1 = arith.constant 0 : index
    %c0_2 = arith.constant 0 : index
    %1 = vector.load %arg1[%c0_1, %c0_2] : memref<16x128xf32, #tpu.memory_space<vmem>>, vector<16x128xf32>
    %cst = arith.constant dense<0.000000e+00> : vector<64x128xf32>
    %2 = tpu.matmul %0, %1, %cst {dimension_numbers = #tpu.dot_dimension_numbers<[1], [0], [0], [1], [0, 0, 1, 1], [], []>} : vector<64x16xf32>, vector<16x128xf32>, vector<64x128xf32> -> vector<64x128xf32>
    %c0_3 = arith.constant 0 : index
    %c0_4 = arith.constant 0 : index
    %3 = vector.load %arg3[%c0_3, %c0_4] : memref<64x1xf32, #tpu.memory_space<vmem>>, vector<64x1xf32>
    %4 = vector.broadcast %3 : vector<64x1xf32> to vector<64x128xf32>
    %5 = arith.addf %2, %4 : vector<64x128xf32>
    %cst_5 = arith.constant 0.000000e+00 : f32
    %6 = vector.broadcast %cst_5 : f32 to vector<64x128xf32>
    %7 = arith.maximumf %5, %6 : vector<64x128xf32>
    %c0_6 = arith.constant 0 : index
    %c0_7 = arith.constant 0 : index
    %c0_8 = arith.constant 0 : index
    %8 = vector.load %arg4[%c0_6, %c0_7, %c0_8] : memref<5x64x64xf32, #tpu.memory_space<vmem>>, vector<1x64x64xf32>
    %9 = vector.shape_cast %8 : vector<1x64x64xf32> to vector<64x64xf32>
    %cst_9 = arith.constant dense<0.000000e+00> : vector<64x128xf32>
    %10 = tpu.matmul %9, %7, %cst_9 {dimension_numbers = #tpu.dot_dimension_numbers<[1], [0], [0], [1], [0, 0, 1, 1], [], []>} : vector<64x64xf32>, vector<64x128xf32>, vector<64x128xf32> -> vector<64x128xf32>
    %c0_10 = arith.constant 0 : index
    %c0_11 = arith.constant 0 : index
    %c0_12 = arith.constant 0 : index
    %11 = vector.load %arg5[%c0_10, %c0_11, %c0_12] : memref<5x64x1xf32, #tpu.memory_space<vmem>>, vector<1x64x1xf32>
    %12 = vector.shape_cast %11 : vector<1x64x1xf32> to vector<64x1xf32>
    %13 = vector.broadcast %12 : vector<64x1xf32> to vector<64x128xf32>
    %14 = arith.addf %10, %13 : vector<64x128xf32>
    %cst_13 = arith.constant 0.000000e+00 : f32
    %15 = vector.broadcast %cst_13 : f32 to vector<64x128xf32>
    %16 = arith.maximumf %14, %15 : vector<64x128xf32>
    %c1 = arith.constant 1 : index
    %c0_14 = arith.constant 0 : index
    %c0_15 = arith.constant 0 : index
    %17 = vector.load %arg4[%c1, %c0_14, %c0_15] : memref<5x64x64xf32, #tpu.memory_space<vmem>>, vector<1x64x64xf32>
    %18 = vector.shape_cast %17 : vector<1x64x64xf32> to vector<64x64xf32>
    %cst_16 = arith.constant dense<0.000000e+00> : vector<64x128xf32>
    %19 = tpu.matmul %18, %16, %cst_16 {dimension_numbers = #tpu.dot_dimension_numbers<[1], [0], [0], [1], [0, 0, 1, 1], [], []>} : vector<64x64xf32>, vector<64x128xf32>, vector<64x128xf32> -> vector<64x128xf32>
    %c1_17 = arith.constant 1 : index
    %c0_18 = arith.constant 0 : index
    %c0_19 = arith.constant 0 : index
    %20 = vector.load %arg5[%c1_17, %c0_18, %c0_19] : memref<5x64x1xf32, #tpu.memory_space<vmem>>, vector<1x64x1xf32>
    %21 = vector.shape_cast %20 : vector<1x64x1xf32> to vector<64x1xf32>
    %22 = vector.broadcast %21 : vector<64x1xf32> to vector<64x128xf32>
    %23 = arith.addf %19, %22 : vector<64x128xf32>
    %cst_20 = arith.constant 0.000000e+00 : f32
    %24 = vector.broadcast %cst_20 : f32 to vector<64x128xf32>
    %25 = arith.maximumf %23, %24 : vector<64x128xf32>
    %c2 = arith.constant 2 : index
    %c0_21 = arith.constant 0 : index
    %c0_22 = arith.constant 0 : index
    %26 = vector.load %arg4[%c2, %c0_21, %c0_22] : memref<5x64x64xf32, #tpu.memory_space<vmem>>, vector<1x64x64xf32>
    %27 = vector.shape_cast %26 : vector<1x64x64xf32> to vector<64x64xf32>
    %cst_23 = arith.constant dense<0.000000e+00> : vector<64x128xf32>
    %28 = tpu.matmul %27, %25, %cst_23 {dimension_numbers = #tpu.dot_dimension_numbers<[1], [0], [0], [1], [0, 0, 1, 1], [], []>} : vector<64x64xf32>, vector<64x128xf32>, vector<64x128xf32> -> vector<64x128xf32>
    %c2_24 = arith.constant 2 : index
    %c0_25 = arith.constant 0 : index
    %c0_26 = arith.constant 0 : index
    %29 = vector.load %arg5[%c2_24, %c0_25, %c0_26] : memref<5x64x1xf32, #tpu.memory_space<vmem>>, vector<1x64x1xf32>
    %30 = vector.shape_cast %29 : vector<1x64x1xf32> to vector<64x1xf32>
    %31 = vector.broadcast %30 : vector<64x1xf32> to vector<64x128xf32>
    %32 = arith.addf %28, %31 : vector<64x128xf32>
    %cst_27 = arith.constant 0.000000e+00 : f32
    %33 = vector.broadcast %cst_27 : f32 to vector<64x128xf32>
    %34 = arith.maximumf %32, %33 : vector<64x128xf32>
    %c3 = arith.constant 3 : index
    %c0_28 = arith.constant 0 : index
    %c0_29 = arith.constant 0 : index
    %35 = vector.load %arg4[%c3, %c0_28, %c0_29] : memref<5x64x64xf32, #tpu.memory_space<vmem>>, vector<1x64x64xf32>
    %36 = vector.shape_cast %35 : vector<1x64x64xf32> to vector<64x64xf32>
    %cst_30 = arith.constant dense<0.000000e+00> : vector<64x128xf32>
    %37 = tpu.matmul %36, %34, %cst_30 {dimension_numbers = #tpu.dot_dimension_numbers<[1], [0], [0], [1], [0, 0, 1, 1], [], []>} : vector<64x64xf32>, vector<64x128xf32>, vector<64x128xf32> -> vector<64x128xf32>
    %c3_31 = arith.constant 3 : index
    %c0_32 = arith.constant 0 : index
    %c0_33 = arith.constant 0 : index
    %38 = vector.load %arg5[%c3_31, %c0_32, %c0_33] : memref<5x64x1xf32, #tpu.memory_space<vmem>>, vector<1x64x1xf32>
    %39 = vector.shape_cast %38 : vector<1x64x1xf32> to vector<64x1xf32>
    %40 = vector.broadcast %39 : vector<64x1xf32> to vector<64x128xf32>
    %41 = arith.addf %37, %40 : vector<64x128xf32>
    %cst_34 = arith.constant 0.000000e+00 : f32
    %42 = vector.broadcast %cst_34 : f32 to vector<64x128xf32>
    %43 = arith.maximumf %41, %42 : vector<64x128xf32>
    %c4 = arith.constant 4 : index
    %c0_35 = arith.constant 0 : index
    %c0_36 = arith.constant 0 : index
    %44 = vector.load %arg4[%c4, %c0_35, %c0_36] : memref<5x64x64xf32, #tpu.memory_space<vmem>>, vector<1x64x64xf32>
    %45 = vector.shape_cast %44 : vector<1x64x64xf32> to vector<64x64xf32>
    %cst_37 = arith.constant dense<0.000000e+00> : vector<64x128xf32>
    %46 = tpu.matmul %45, %43, %cst_37 {dimension_numbers = #tpu.dot_dimension_numbers<[1], [0], [0], [1], [0, 0, 1, 1], [], []>} : vector<64x64xf32>, vector<64x128xf32>, vector<64x128xf32> -> vector<64x128xf32>
    %c4_38 = arith.constant 4 : index
    %c0_39 = arith.constant 0 : index
    %c0_40 = arith.constant 0 : index
    %47 = vector.load %arg5[%c4_38, %c0_39, %c0_40] : memref<5x64x1xf32, #tpu.memory_space<vmem>>, vector<1x64x1xf32>
    %48 = vector.shape_cast %47 : vector<1x64x1xf32> to vector<64x1xf32>
    %49 = vector.broadcast %48 : vector<64x1xf32> to vector<64x128xf32>
    %50 = arith.addf %46, %49 : vector<64x128xf32>
    %cst_41 = arith.constant 0.000000e+00 : f32
    %51 = vector.broadcast %cst_41 : f32 to vector<64x128xf32>
    %52 = arith.maximumf %50, %51 : vector<64x128xf32>
    %53 = vector.extract_strided_slice %52 {offsets = [0, 0], sizes = [32, 128], strides = [1, 1]} : vector<64x128xf32> to vector<32x128xf32>
    %54 = vector.extract_strided_slice %52 {offsets = [32, 0], sizes = [32, 128], strides = [1, 1]} : vector<64x128xf32> to vector<32x128xf32>
    %c0_42 = arith.constant 0 : index
    %c0_43 = arith.constant 0 : index
    %55 = vector.load %arg6[%c0_42, %c0_43] : memref<512x64xf32, #tpu.memory_space<vmem>>, vector<512x64xf32>
    %cst_44 = arith.constant dense<0.000000e+00> : vector<512x128xf32>
    %56 = tpu.matmul %55, %52, %cst_44 {dimension_numbers = #tpu.dot_dimension_numbers<[1], [0], [0], [1], [0, 0, 1, 1], [], []>} : vector<512x64xf32>, vector<64x128xf32>, vector<512x128xf32> -> vector<512x128xf32>
    %c0_45 = arith.constant 0 : index
    %c0_46 = arith.constant 0 : index
    %57 = vector.load %arg7[%c0_45, %c0_46] : memref<512x1xf32, #tpu.memory_space<vmem>>, vector<512x1xf32>
    %58 = vector.broadcast %57 : vector<512x1xf32> to vector<512x128xf32>
    %59 = arith.addf %56, %58 : vector<512x128xf32>
    %60 = math.tanh %59 : vector<512x128xf32>
    %c0_47 = arith.constant 0 : index
    %c0_48 = arith.constant 0 : index
    %61 = vector.load %arg8[%c0_47, %c0_48] : memref<64x512xf32, #tpu.memory_space<vmem>>, vector<64x512xf32>
    %cst_49 = arith.constant dense<0.000000e+00> : vector<64x128xf32>
    %62 = tpu.matmul %61, %60, %cst_49 {dimension_numbers = #tpu.dot_dimension_numbers<[1], [0], [0], [1], [0, 0, 1, 1], [], []>} : vector<64x512xf32>, vector<512x128xf32>, vector<64x128xf32> -> vector<64x128xf32>
    %c0_50 = arith.constant 0 : index
    %c0_51 = arith.constant 0 : index
    %63 = vector.load %arg9[%c0_50, %c0_51] : memref<64x1xf32, #tpu.memory_space<vmem>>, vector<64x1xf32>
    %64 = vector.broadcast %63 : vector<64x1xf32> to vector<64x128xf32>
    %65 = arith.addf %62, %64 : vector<64x128xf32>
    %66 = vector.extract_strided_slice %65 {offsets = [32, 0], sizes = [32, 128], strides = [1, 1]} : vector<64x128xf32> to vector<32x128xf32>
    %67 = vector.extract_strided_slice %65 {offsets = [0, 0], sizes = [32, 128], strides = [1, 1]} : vector<64x128xf32> to vector<32x128xf32>
    %68 = arith.subf %66, %67 : vector<32x128xf32>
    %69 = arith.negf %68 : vector<32x128xf32>
    %70 = math.exp %69 : vector<32x128xf32>
    %cst_52 = arith.constant 1.000000e+00 : f32
    %71 = vector.broadcast %cst_52 : f32 to vector<32x128xf32>
    %72 = arith.addf %71, %70 : vector<32x128xf32>
    %73 = arith.divf %71, %72 : vector<32x128xf32>
    %74 = arith.subf %54, %53 : vector<32x128xf32>
    %75 = arith.mulf %73, %74 : vector<32x128xf32>
    %76 = arith.addf %53, %75 : vector<32x128xf32>
    %c0_53 = arith.constant 0 : index
    %c0_54 = arith.constant 0 : index
    %77 = vector.load %arg10[%c0_53, %c0_54] : memref<16x32xf32, #tpu.memory_space<vmem>>, vector<16x32xf32>
    %cst_55 = arith.constant dense<0.000000e+00> : vector<16x128xf32>
    %78 = tpu.matmul %77, %76, %cst_55 {dimension_numbers = #tpu.dot_dimension_numbers<[1], [0], [0], [1], [0, 0, 1, 1], [], []>} : vector<16x32xf32>, vector<32x128xf32>, vector<16x128xf32> -> vector<16x128xf32>
    %c0_56 = arith.constant 0 : index
    %c0_57 = arith.constant 0 : index
    %79 = vector.load %arg11[%c0_56, %c0_57] : memref<16x1xf32, #tpu.memory_space<vmem>>, vector<16x1xf32>
    %80 = vector.broadcast %79 : vector<16x1xf32> to vector<16x128xf32>
    %81 = arith.addf %78, %80 : vector<16x128xf32>
    %c0_58 = arith.constant 0 : index
    %c0_59 = arith.constant 0 : index
    %82 = vector.load %arg12[%c0_58, %c0_59] : memref<16x128xf32, #tpu.memory_space<vmem>>, vector<16x128xf32>
    tpu.vector_store %arg12[%c0_58, %c0_59], %81 {strides = array<i32>} : memref<16x128xf32, #tpu.memory_space<vmem>>, vector<16x128xf32>,
    return
  }
  func.func @transform_0(%arg0: i32) -> (i32, i32) {
    %c0_i32 = arith.constant 0 : i32
    %c0_i32_0 = arith.constant 0 : i32
    return %c0_i32, %arg0 : i32, i32
  }
  func.func @transform_1(%arg0: i32) -> (i32, i32) {
    %c0_i32 = arith.constant 0 : i32
    %c0_i32_0 = arith.constant 0 : i32
    %c0_i32_1 = arith.constant 0 : i32
    return %c0_i32, %c0_i32_0 : i32, i32
  }
  func.func @transform_2(%arg0: i32) -> (i32, i32) {
    %c0_i32 = arith.constant 0 : i32
    %c0_i32_0 = arith.constant 0 : i32
    %c0_i32_1 = arith.constant 0 : i32
    return %c0_i32, %c0_i32_0 : i32, i32
  }
  func.func @transform_3(%arg0: i32) -> (i32, i32, i32) {
    %c0_i32 = arith.constant 0 : i32
    %c0_i32_0 = arith.constant 0 : i32
    %c0_i32_1 = arith.constant 0 : i32
    %c0_i32_2 = arith.constant 0 : i32
    return %c0_i32, %c0_i32_0, %c0_i32_1 : i32, i32, i32
  }
  func.func @transform_4(%arg0: i32) -> (i32, i32, i32) {
    %c0_i32 = arith.constant 0 : i32
    %c0_i32_0 = arith.constant 0 : i32
    %c0_i32_1 = arith.constant 0 : i32
    %c0_i32_2 = arith.constant 0 : i32
    return %c0_i32, %c0_i32_0, %c0_i32_1 : i32, i32, i32
  }
  func.func @transform_5(%arg0: i32) -> (i32, i32) {
    %c0_i32 = arith.constant 0 : i32
    %c0_i32_0 = arith.constant 0 : i32
    %c0_i32_1 = arith.constant 0 : i32
    return %c0_i32, %c0_i32_0 : i32, i32
  }
  func.func @transform_6(%arg0: i32) -> (i32, i32) {
    %c0_i32 = arith.constant 0 : i32
    %c0_i32_0 = arith.constant 0 : i32
    %c0_i32_1 = arith.constant 0 : i32
    return %c0_i32, %c0_i32_0 : i32, i32
  }
  func.func @transform_7(%arg0: i32) -> (i32, i32) {
    %c0_i32 = arith.constant 0 : i32
    %c0_i32_0 = arith.constant 0 : i32
    %c0_i32_1 = arith.constant 0 : i32
    return %c0_i32, %c0_i32_0 : i32, i32
  }
  func.func @transform_8(%arg0: i32) -> (i32, i32) {
    %c0_i32 = arith.constant 0 : i32
    %c0_i32_0 = arith.constant 0 : i32
    %c0_i32_1 = arith.constant 0 : i32
    return %c0_i32, %c0_i32_0 : i32, i32
  }
  func.func @transform_9(%arg0: i32) -> (i32, i32) {
    %c0_i32 = arith.constant 0 : i32
    %c0_i32_0 = arith.constant 0 : i32
    %c0_i32_1 = arith.constant 0 : i32
    return %c0_i32, %c0_i32_0 : i32, i32
  }
  func.func @transform_10(%arg0: i32) -> (i32, i32) {
    %c0_i32 = arith.constant 0 : i32
    %c0_i32_0 = arith.constant 0 : i32
    %c0_i32_1 = arith.constant 0 : i32
    return %c0_i32, %c0_i32_0 : i32, i32
  }
  func.func @transform_11(%arg0: i32) -> (i32, i32) {
    %c0_i32 = arith.constant 0 : i32
    %c0_i32_0 = arith.constant 0 : i32
    return %c0_i32, %arg0 : i32, i32
  }
}

</mosaic_0001>

<bundles_post_ra>
// kernel: tpu_custom_call.1
= control target key start
LH: loop header
LB: loop body
LE: loop exit
PB: predicated region body
PF: predicated region fallthrough
CT: control target
= control target key end

     0   :  { %v2521_v3 = vmov 0   ;;  %vm97_vm0 = vcmask 130048   ;;  %s3798_s0 = inlined_call_operand.vmem [shape: f32[16,128], index: 0, kind: input, shape index: {}]   ;;  %s3799_s1 = inlined_call_operand.vmem [shape: f32[64,16], index: 1, kind: input, shape index: {}]   ;;  %s3800_s2 = inlined_call_operand.vmem [shape: f32[64,1], index: 2, kind: input, shape index: {}]   ;;  %s3801_s3 = inlined_call_operand.vmem [shape: f32[5,64,64], index: 3, kind: input, shape index: {}]   ;;  %s3802_s4 = inlined_call_operand.vmem [shape: f32[5,64,1], index: 4, kind: input, shape index: {}]   ;;  %s3803_s5 = inlined_call_operand.vmem [shape: f32[512,64], index: 5, kind: input, shape index: {}]   ;;  %s3804_s6 = inlined_call_operand.vmem [shape: f32[512,1], index: 6, kind: input, shape index: {}]   ;;  %s3805_s7 = inlined_call_operand.vmem [shape: f32[64,512], index: 7, kind: input, shape index: {}]   ;;  %s3806_s8 = inlined_call_operand.vmem [shape: f32[64,1], index: 8, kind: input, shape index: {}]   ;;  %s3807_s9 = inlined_call_operand.vmem [shape: f32[16,32], index: 9, kind: input, shape index: {}]   ;;  %s3808_s10 = inlined_call_operand.vmem [shape: f32[16,1], index: 10, kind: input, shape index: {}]   ;;  %s3809_s11 = inlined_call_operand.hbm [shape: f32[16,128], index: 11, kind: output, shape index: {}]  }
   0x1   :  { %v48_v0 = vld [vmem:[%s3798_s0 + $0x8] sm:$0xff]  ;;  %v56_v1 = vld [vmem:[%s3800_s2 + $0x38] sm:$0xff]  ;;  %2350 = vset.pattern.permute.xlu2 %v2521_v3  ;;  %2349 = vset.pattern.permute.xlu1 %v2521_v3  ;;  %v47_v5 = vld [vmem:[%s3798_s0] sm:$0xff] }
   0x2   :  { %v54_v2 = vld [vmem:[%s3800_s2 + $0x28] sm:$0xff]  ;;  %v52_v4 = vld [vmem:[%s3800_s2 + $0x18] sm:$0xff]  ;;  %2348 = vset.pattern.permute.xlu0 %v2521_v3  ;;  %136 = vmatpush.msra.mxu0 %v48_v0  ;;  %v39_v6 = vld [vmem:[%s3799_s1] sm:$0xff] }
   0x3   :  { %94 = vperm.xlu0 %2348, %v56_v1   ;;  %84 = vperm.xlu1 %2349, %v54_v2  }
   0x4   :  { %74 = vperm.xlu2 %2350, %v52_v4   ;;  %137 = vmatpush.msra.mxu0 %v47_v5 }
   0x5   :  { %2138 = vmatmul.msk.f32.vlgmr.msra.gmra.mxu0 %vm97_vm0, %v39_v6 }
   0x6   :  { %16 = vsyncpa [#allocation3], 0  ;;  %v55_v7 = vld [vmem:[%s3800_s2 + $0x30] sm:$0xff]  ;;  %v53_v8 = vld [vmem:[%s3800_s2 + $0x20] sm:$0xff]  ;;  %vm227_vm1 = vcmask 523264   ;;  %s2126_s21 = sshll.u32 %s3809_s11, 4  ;;  %s2127_s21 = int_to_ptr.hbm [resolvable:$true] %s2126_s21 }
   0x7   :  { %v51_v9 = vld [vmem:[%s3800_s2 + $0x10] sm:$0xff]  ;;  %v40_v10 = vld [vmem:[%s3799_s1 + $0x8] sm:$0xff]  ;;  %v49_v12 = vld [vmem:[%s3800_s2] sm:$0xff]  ;;  %s2523_s22 = smov 128   ;;  %s2524_s23 = smov 8  }
   0x8   :  { %v50_v11 = vld [vmem:[%s3800_s2 + $0x8] sm:$0xff]  ;;  %v186_v13 = vld [vmem:[%s3802_s4 + $0x38] sm:$0xff]  ;;  %v41_v14 = vld [vmem:[%s3799_s1 + $0x10] sm:$0xff] }
   0x9   :  { %v185_v15 = vld [vmem:[%s3802_s4 + $0x30] sm:$0xff]  ;;  %v184_v16 = vld [vmem:[%s3802_s4 + $0x28] sm:$0xff]  ;;  %v183_v17 = vld [vmem:[%s3802_s4 + $0x20] sm:$0xff] }
   0xa   :  { %v42_v18 = vld [vmem:[%s3799_s1 + $0x18] sm:$0xff]  ;;  %v181_v20 = vld [vmem:[%s3802_s4 + $0x10] sm:$0xff]  ;;  %v180_v21 = vld [vmem:[%s3802_s4 + $0x8] sm:$0xff] }
   0xb   :  { %89 = vperm.xlu0 %2348, %v55_v7   ;;  %79 = vperm.xlu1 %2349, %v53_v8   ;;  %v182_v19 = vld [vmem:[%s3802_s4 + $0x18] sm:$0xff]  ;;  %v43_v22 = vld [vmem:[%s3799_s1 + $0x20] sm:$0xff]  ;;  %v2168_v25 = vld [vmem:[%s3802_s4 + $0x70] sm:$0xff] }
   0xc   :  { %69 = vperm.xlu2 %2350, %v51_v9   ;;  %v179_v23 = vld [vmem:[%s3802_s4] sm:$0xff]  ;;  %v2169_v24 = vld [vmem:[%s3802_s4 + $0x78] sm:$0xff]  ;;  %v44_v26 = vld [vmem:[%s3799_s1 + $0x28] sm:$0xff] }
   0xd   :  { %2139 = vmatmul.msk.f32.gmra.mxu0 %vm97_vm0, %v40_v10  ;;  %v2167_v27 = vld [vmem:[%s3802_s4 + $0x68] sm:$0xff]  ;;  %v2166_v28 = vld [vmem:[%s3802_s4 + $0x60] sm:$0xff]  ;;  %v2165_v29 = vld [vmem:[%s3802_s4 + $0x58] sm:$0xff] }
   0xe   :  { %v45_v30 = vld [vmem:[%s3799_s1 + $0x30] sm:$0xff]  ;;  %v2163_v32 = vld [vmem:[%s3802_s4 + $0x48] sm:$0xff]  ;;  %v2162_v33 = vld [vmem:[%s3802_s4 + $0x40] sm:$0xff] }
   0xf   :  { %v2164_v31 = vld [vmem:[%s3802_s4 + $0x50] sm:$0xff]  ;;  %v46_v34 = vld [vmem:[%s3799_s1 + $0x38] sm:$0xff]  ;;  %v2191_v37 = vld [vmem:[%s3802_s4 + $0xa8] sm:$0xff] }
  0x10   :  { %v2193_v35 = vld [vmem:[%s3802_s4 + $0xb8] sm:$0xff]  ;;  %v2192_v36 = vld [vmem:[%s3802_s4 + $0xb0] sm:$0xff]  ;;  %v2190_v38 = vld [vmem:[%s3802_s4 + $0xa0] sm:$0xff] }
  0x11   :  { %v2189_v39 = vld [vmem:[%s3802_s4 + $0x98] sm:$0xff]  ;;  %v2188_v40 = vld [vmem:[%s3802_s4 + $0x90] sm:$0xff]  ;;  %v2187_v41 = vld [vmem:[%s3802_s4 + $0x88] sm:$0xff] }
  0x12   :  { %v2186_v42 = vld [vmem:[%s3802_s4 + $0x80] sm:$0xff]  ;;  %v2217_v43 = vld [vmem:[%s3802_s4 + $0xf8] sm:$0xff]  ;;  %v2216_v44 = vld [vmem:[%s3802_s4 + $0xf0] sm:$0xff] }
  0x13   :  { %64 = vperm.xlu0 %2348, %v50_v11   ;;  %59 = vperm.xlu1 %2349, %v49_v12   ;;  %v2215_v45 = vld [vmem:[%s3802_s4 + $0xe8] sm:$0xff]  ;;  %v2214_v46 = vld [vmem:[%s3802_s4 + $0xe0] sm:$0xff]  ;;  %v2213_v47 = vld [vmem:[%s3802_s4 + $0xd8] sm:$0xff] }
  0x14   :  { %224 = vperm.xlu2 %2350, %v186_v13   ;;  %v2212_v48 = vld [vmem:[%s3802_s4 + $0xd0] sm:$0xff]  ;;  %v2211_v49 = vld [vmem:[%s3802_s4 + $0xc8] sm:$0xff]  ;;  %v2210_v50 = vld [vmem:[%s3802_s4 + $0xc0] sm:$0xff] }
  0x15   :  { %2140 = vmatmul.msk.f32.gmra.mxu0 %vm97_vm0, %v41_v14  ;;  %v2241_v51 = vld [vmem:[%s3802_s4 + $0x138] sm:$0xff]  ;;  %v2240_v52 = vld [vmem:[%s3802_s4 + $0x130] sm:$0xff]  ;;  %v2239_v53 = vld [vmem:[%s3802_s4 + $0x128] sm:$0xff] }
  0x16   :  { %v2238_v54 = vld [vmem:[%s3802_s4 + $0x120] sm:$0xff]  ;;  %v2237_v55 = vld [vmem:[%s3802_s4 + $0x118] sm:$0xff]  ;;  %v2236_v56 = vld [vmem:[%s3802_s4 + $0x110] sm:$0xff] }
  0x17   :  { %v2235_v57 = vld [vmem:[%s3802_s4 + $0x108] sm:$0xff]  ;;  %v2234_v58 = vld [vmem:[%s3802_s4 + $0x100] sm:$0xff]  ;;  %v904_v59 = vld [vmem:[%s3804_s6 + $0x78] sm:$0xff] }
  0x18   :  { %v903_v60 = vld [vmem:[%s3804_s6 + $0x70] sm:$0xff]  ;;  %v902_v61 = vld [vmem:[%s3804_s6 + $0x68] sm:$0xff]  ;;  %v901_v63 = vld [vmem:[%s3804_s6 + $0x60] sm:$0xff] }
  0x19   :  { %v900_v0 = vld [vmem:[%s3804_s6 + $0x58] sm:$0xff]  ;;  %v899_v1 = vld [vmem:[%s3804_s6 + $0x50] sm:$0xff]  ;;  %v898_v3 = vld [vmem:[%s3804_s6 + $0x48] sm:$0xff] }
  0x1a   :  { %v897_v4 = vld [vmem:[%s3804_s6 + $0x40] sm:$0xff]  ;;  %v896_v5 = vld [vmem:[%s3804_s6 + $0x38] sm:$0xff]  ;;  %v895_v7 = vld [vmem:[%s3804_s6 + $0x30] sm:$0xff] }
  0x1b   :  { %219 = vperm.xlu0 %2348, %v185_v15   ;;  %214 = vperm.xlu1 %2349, %v184_v16   ;;  %v894_v8 = vld [vmem:[%s3804_s6 + $0x28] sm:$0xff]  ;;  %v893_v9 = vld [vmem:[%s3804_s6 + $0x20] sm:$0xff]  ;;  %v892_v11 = vld [vmem:[%s3804_s6 + $0x18] sm:$0xff] }
  0x1c   :  { %209 = vperm.xlu2 %2350, %v183_v17   ;;  %v891_v12 = vld [vmem:[%s3804_s6 + $0x10] sm:$0xff]  ;;  %v890_v13 = vld [vmem:[%s3804_s6 + $0x8] sm:$0xff]  ;;  %v889_v15 = vld [vmem:[%s3804_s6] sm:$0xff] }
  0x1d   :  { %2141 = vmatmul.msk.f32.gmra.mxu0 %vm97_vm0, %v42_v18  ;;  %v952_v16 = vld [vmem:[%s3804_s6 + $0x1f8] sm:$0xff] }
  0x1e   :  { %v920_v17 = vld [vmem:[%s3804_s6 + $0xf8] sm:$0xff] }
  0x23   :  { %204 = vperm.xlu0 %2348, %v182_v19   ;;  %199 = vperm.xlu1 %2349, %v181_v20   ;;  %v951_v20 = vld [vmem:[%s3804_s6 + $0x1f0] sm:$0xff] }
  0x24   :  { %194 = vperm.xlu2 %2350, %v180_v21   ;;  %v919_v21 = vld [vmem:[%s3804_s6 + $0xf0] sm:$0xff] }
  0x25   :  { %2142 = vmatmul.msk.f32.gmra.mxu0 %vm97_vm0, %v43_v22 }
  0x2b   :  { %189 = vperm.xlu0 %2348, %v179_v23   ;;  %356 = vperm.xlu1 %2349, %v2169_v24   ;;  %v936_v23 = vld [vmem:[%s3804_s6 + $0x178] sm:$0xff] }
  0x2c   :  { %351 = vperm.xlu2 %2350, %v2168_v25   ;;  %v950_v25 = vld [vmem:[%s3804_s6 + $0x1e8] sm:$0xff] }
  0x2d   :  { %2143 = vmatmul.msk.f32.gmra.mxu0 %vm97_vm0, %v44_v26  ;;  %v918_v26 = vld [vmem:[%s3804_s6 + $0xe8] sm:$0xff] }
  0x33   :  { %346 = vperm.xlu0 %2348, %v2167_v27   ;;  %341 = vperm.xlu1 %2349, %v2166_v28   ;;  %v935_v28 = vld [vmem:[%s3804_s6 + $0x170] sm:$0xff] }
  0x34   :  { %336 = vperm.xlu2 %2350, %v2165_v29  }
  0x35   :  { %2144 = vmatmul.msk.f32.gmra.mxu0 %vm97_vm0, %v45_v30 }
  0x3b   :  { %331 = vperm.xlu0 %2348, %v2164_v31   ;;  %326 = vperm.xlu1 %2349, %v2163_v32  }
  0x3c   :  { %321 = vperm.xlu2 %2350, %v2162_v33  }
  0x3d   :  { %2145 = vmatmul.msk.f32.gmra.mxu0 %vm97_vm0, %v46_v34 }
  0x43   :  { %487 = vperm.xlu0 %2348, %v2193_v35   ;;  %482 = vperm.xlu1 %2349, %v2192_v36  }
  0x44   :  { %477 = vperm.xlu2 %2350, %v2191_v37  }
  0x4b   :  { %472 = vperm.xlu0 %2348, %v2190_v38   ;;  %467 = vperm.xlu1 %2349, %v2189_v39   ;;  %v949_v38 = vld [vmem:[%s3804_s6 + $0x1e0] sm:$0xff] }
  0x4c   :  { %462 = vperm.xlu2 %2350, %v2188_v40   ;;  %v917_v39 = vld [vmem:[%s3804_s6 + $0xe0] sm:$0xff]  ;;  %v934_v40 = vld [vmem:[%s3804_s6 + $0x168] sm:$0xff] }
  0x53   :  { %457 = vperm.xlu0 %2348, %v2187_v41   ;;  %452 = vperm.xlu1 %2349, %v2186_v42  }
  0x54   :  { %618 = vperm.xlu2 %2350, %v2217_v43  }
  0x5b   :  { %613 = vperm.xlu0 %2348, %v2216_v44   ;;  %608 = vperm.xlu1 %2349, %v2215_v45  }
  0x5c   :  { %603 = vperm.xlu2 %2350, %v2214_v46  }
  0x5e   :  { %v75_v27 = vpop.permute.xlu2 %74 }
  0x63   :  { %598 = vperm.xlu0 %2348, %v2213_v47   ;;  %593 = vperm.xlu1 %2349, %v2212_v48  }
  0x64   :  { %588 = vperm.xlu2 %2350, %v2211_v49  }
  0x66   :  { %v70_v43 = vpop.permute.xlu2 %69 }
  0x6b   :  { %583 = vperm.xlu0 %2348, %v2210_v50   ;;  %749 = vperm.xlu1 %2349, %v2241_v51  }
  0x6c   :  { %744 = vperm.xlu2 %2350, %v2240_v52   ;;  %v948_v52 = vld [vmem:[%s3804_s6 + $0x1d8] sm:$0xff] }
  0x73   :  { %739 = vperm.xlu0 %2348, %v2239_v53   ;;  %734 = vperm.xlu1 %2349, %v2238_v54   ;;  %v916_v53 = vld [vmem:[%s3804_s6 + $0xd8] sm:$0xff]  ;;  %v933_v54 = vld [vmem:[%s3804_s6 + $0x160] sm:$0xff] }
  0x74   :  { %729 = vperm.xlu2 %2350, %v2237_v55  }
  0x75   :  { %v95_v19 = vpop.permute.xlu0 %94  ;;  %v85_v22 = vpop.permute.xlu1 %84 }
  0x7b   :  { %724 = vperm.xlu0 %2348, %v2236_v56   ;;  %719 = vperm.xlu1 %2349, %v2235_v57   ;;  %v171_v57 = vld [vmem:[%s3801_s3] sm:$0xff] }
  0x7c   :  { %714 = vperm.xlu2 %2350, %v2234_v58   ;;  %v947_v58 = vld [vmem:[%s3804_s6 + $0x1d0] sm:$0xff] }
  0x7d   :  { %v90_v29 = vpop.permute.xlu0 %89  ;;  %v80_v31 = vpop.permute.xlu1 %79 }
  0x82   :  { %v2776_v62 = vpop.f32.mrf.mxu0 }
  0x83   :  { %1030 = vperm.xlu0 %2348, %v904_v59   ;;  %1025 = vperm.xlu1 %2349, %v903_v60   ;;  %v915_v59 = vld [vmem:[%s3804_s6 + $0xd0] sm:$0xff]  ;;  %v932_v60 = vld [vmem:[%s3804_s6 + $0x158] sm:$0xff] }
  0x84   :  { %1020 = vperm.xlu2 %2350, %v902_v61   ;;  %v172_v61 = vld [vmem:[%s3801_s3 + $0x8] sm:$0xff] }
  0x85   :  { %v65_v46 = vpop.permute.xlu0 %64  ;;  %v60_v47 = vpop.permute.xlu1 %59 }
  0x86   :  { %v140_v50 = vadd.f32 %v2776_v62, %v60_v47  ;;  %v946_v62 = vld [vmem:[%s3804_s6 + $0x1c8] sm:$0xff] }
  0x88   :  { %v163_v56 = vmax.f32 %v140_v50, 0.0 }
  0x8a   :  { %v2787_v2 = vpop.f32.mrf.mxu0 }
  0x8b   :  { %1015 = vperm.xlu0 %2348, %v901_v63   ;;  %1010 = vperm.xlu1 %2349, %v900_v0   ;;  %v143_v48 = vadd.f32 %v2787_v2, %v65_v46  ;;  %v914_v63 = vld [vmem:[%s3804_s6 + $0xc8] sm:$0xff]  ;;  %v931_v0 = vld [vmem:[%s3804_s6 + $0x150] sm:$0xff]  ;;  %v945_v2 = vld [vmem:[%s3804_s6 + $0x1c0] sm:$0xff] }
  0x8c   :  { %1005 = vperm.xlu2 %2350, %v899_v1   ;;  %v173_v1 = vld [vmem:[%s3801_s3 + $0x10] sm:$0xff] }
  0x8d   :  { %v164_v55 = vmax.f32 %v143_v48, 0.0 }
  0x92   :  { %v145_v6 = vpop.f32.mrf.mxu0 }
  0x93   :  { %1000 = vperm.xlu0 %2348, %v898_v3   ;;  %995 = vperm.xlu1 %2349, %v897_v4   ;;  %v146_v44 = vadd.f32 %v145_v6, %v70_v43  ;;  %v913_v3 = vld [vmem:[%s3804_s6 + $0xc0] sm:$0xff]  ;;  %v930_v4 = vld [vmem:[%s3804_s6 + $0x148] sm:$0xff]  ;;  %v944_v6 = vld [vmem:[%s3804_s6 + $0x1b8] sm:$0xff] }
  0x94   :  { %990 = vperm.xlu2 %2350, %v896_v5   ;;  %v174_v5 = vld [vmem:[%s3801_s3 + $0x18] sm:$0xff]  ;;  %v2076_v43 = vld [vmem:[%s3808_s10] sm:$0xff] }
  0x95   :  { %v165_v51 = vmax.f32 %v146_v44, 0.0  ;;  %v2077_v44 = vld [vmem:[%s3808_s10 + $0x8] sm:$0xff] }
  0x9a   :  { %v148_v10 = vpop.f32.mrf.mxu0 }
  0x9b   :  { %985 = vperm.xlu0 %2348, %v895_v7   ;;  %980 = vperm.xlu1 %2349, %v894_v8   ;;  %v149_v41 = vadd.f32 %v148_v10, %v75_v27  ;;  %v912_v7 = vld [vmem:[%s3804_s6 + $0xb8] sm:$0xff]  ;;  %v929_v8 = vld [vmem:[%s3804_s6 + $0x140] sm:$0xff]  ;;  %v943_v10 = vld [vmem:[%s3804_s6 + $0x1b0] sm:$0xff] }
  0x9c   :  { %975 = vperm.xlu2 %2350, %v893_v9   ;;  %v175_v9 = vld [vmem:[%s3801_s3 + $0x20] sm:$0xff]  ;;  %v924_v27 = vld [vmem:[%s3804_s6 + $0x118] sm:$0xff] }
  0x9d   :  { %v166_v49 = vmax.f32 %v149_v41, 0.0  ;;  %v1770_v41 = vld [vmem:[%s3806_s8] sm:$0xff] }
  0xa2   :  { %v151_v14 = vpop.f32.mrf.mxu0 }
  0xa3   :  { %970 = vperm.xlu0 %2348, %v892_v11   ;;  %965 = vperm.xlu1 %2349, %v891_v12   ;;  %v152_v37 = vadd.f32 %v151_v14, %v80_v31  ;;  %v911_v11 = vld [vmem:[%s3804_s6 + $0xb0] sm:$0xff]  ;;  %v928_v12 = vld [vmem:[%s3804_s6 + $0x138] sm:$0xff]  ;;  %v942_v14 = vld [vmem:[%s3804_s6 + $0x1a8] sm:$0xff] }
  0xa4   :  { %960 = vperm.xlu2 %2350, %v890_v13   ;;  %v176_v13 = vld [vmem:[%s3801_s3 + $0x28] sm:$0xff]  ;;  %v937_v31 = vld [vmem:[%s3804_s6 + $0x180] sm:$0xff] }
  0xa5   :  { %v167_v45 = vmax.f32 %v152_v37, 0.0  ;;  %v1772_v37 = vld [vmem:[%s3806_s8 + $0x10] sm:$0xff] }
  0xaa   :  { %v154_v18 = vpop.f32.mrf.mxu0 }
  0xab   :  { %955 = vperm.xlu0 %2348, %v889_v15   ;;  %1270 = vperm.xlu1 %2349, %v952_v16   ;;  %v155_v35 = vadd.f32 %v154_v18, %v85_v22  ;;  %v910_v15 = vld [vmem:[%s3804_s6 + $0xa8] sm:$0xff]  ;;  %v927_v16 = vld [vmem:[%s3804_s6 + $0x130] sm:$0xff]  ;;  %v941_v18 = vld [vmem:[%s3804_s6 + $0x1a0] sm:$0xff] }
  0xac   :  { %1110 = vperm.xlu2 %2350, %v920_v17   ;;  %v177_v17 = vld [vmem:[%s3801_s3 + $0x30] sm:$0xff]  ;;  %v940_v22 = vld [vmem:[%s3804_s6 + $0x198] sm:$0xff] }
  0xad   :  { %v168_v42 = vmax.f32 %v155_v35, 0.0  ;;  %v1773_v35 = vld [vmem:[%s3806_s8 + $0x18] sm:$0xff] }
  0xb2   :  { %v157_v24 = vpop.f32.mrf.mxu0 }
  0xb3   :  { %1265 = vperm.xlu0 %2348, %v951_v20   ;;  %1105 = vperm.xlu1 %2349, %v919_v21   ;;  %v158_v32 = vadd.f32 %v157_v24, %v90_v29  ;;  %v926_v20 = vld [vmem:[%s3804_s6 + $0x128] sm:$0xff]  ;;  %v178_v21 = vld [vmem:[%s3801_s3 + $0x38] sm:$0xff]  ;;  %v925_v24 = vld [vmem:[%s3804_s6 + $0x120] sm:$0xff] }
  0xb4   :  { %1190 = vperm.xlu2 %2350, %v936_v23   ;;  %v908_v23 = vld [vmem:[%s3804_s6 + $0x98] sm:$0xff]  ;;  %v906_v29 = vld [vmem:[%s3804_s6 + $0x88] sm:$0xff] }
  0xb5   :  { %v169_v36 = vmax.f32 %v158_v32, 0.0  ;;  %v905_v32 = vld [vmem:[%s3804_s6 + $0x80] sm:$0xff] }
  0xba   :  { %v160_v30 = vpop.f32.mrf.mxu0 }
  0xbb   :  { %1260 = vperm.xlu0 %2348, %v950_v25   ;;  %1100 = vperm.xlu1 %2349, %v918_v26   ;;  %v161_v33 = vadd.f32 %v160_v30, %v95_v19  ;;  %v909_v19 = vld [vmem:[%s3804_s6 + $0xa0] sm:$0xff]  ;;  %v939_v25 = vld [vmem:[%s3804_s6 + $0x190] sm:$0xff] }
  0xbc   :  { %1185 = vperm.xlu2 %2350, %v935_v28   ;;  %v907_v26 = vld [vmem:[%s3804_s6 + $0x90] sm:$0xff]  ;;  %v938_v28 = vld [vmem:[%s3804_s6 + $0x188] sm:$0xff] }
  0xbd   :  { %v170_v34 = vmax.f32 %v161_v33, 0.0  ;;  %v923_v30 = vld [vmem:[%s3804_s6 + $0x110] sm:$0xff]  ;;  %v922_v33 = vld [vmem:[%s3804_s6 + $0x108] sm:$0xff] }
  0xbf   :  { %260 = vmatpush.msra.mxu1 %v170_v34  ;;  %v921_v34 = vld [vmem:[%s3804_s6 + $0x100] sm:$0xff]  ;;  %s2522_s6 = smov [#allocation2]  }
  0xc0   :  { %s2124_s18 = sshll.u32 %s2522_s6, 4  ;;  %s2125_s18 = int_to_ptr.vmem [resolvable:$true] %s2124_s18 }
  0xc1   :  { %261 = vmatpush.msra.mxu1 %v169_v36  ;;  %v1777_v36 = vld [vmem:[%s3806_s8 + $0x38] sm:$0xff] }
  0xc3   :  { %1255 = vperm.xlu0 %2348, %v949_v38   ;;  %1095 = vperm.xlu1 %2349, %v917_v39   ;;  %v1776_v38 = vld [vmem:[%s3806_s8 + $0x30] sm:$0xff]  ;;  %v1771_v39 = vld [vmem:[%s3806_s8 + $0x8] sm:$0xff] }
  0xc4   :  { %1180 = vperm.xlu2 %2350, %v934_v40   ;;  %262 = vmatpush.msra.mxu1 %v168_v42  ;;  %v1775_v40 = vld [vmem:[%s3806_s8 + $0x28] sm:$0xff]  ;;  %v1774_v42 = vld [vmem:[%s3806_s8 + $0x20] sm:$0xff] }
  0xc6   :  { %263 = vmatpush.msra.mxu1 %v167_v45 }
  0xc8   :  { %264 = vmatpush.msra.mxu1 %v166_v49 }
  0xca   :  { %265 = vmatpush.msra.mxu1 %v165_v51  ;;  %v225_v51 = vpop.permute.xlu2 %224 }
  0xcb   :  { %1250 = vperm.xlu0 %2348, %v948_v52   ;;  %1090 = vperm.xlu1 %2349, %v916_v53   ;;  %v220_v52 = vpop.permute.xlu0 %219 }
  0xcc   :  { %1175 = vperm.xlu2 %2350, %v933_v54   ;;  %266 = vmatpush.msra.mxu1 %v164_v55  ;;  %v215_v54 = vpop.permute.xlu1 %214 }
  0xce   :  { %267 = vmatpush.msra.mxu1 %v163_v56 }
  0xcf   :  { %2146 = vmatmul.msk.f32.vlgmr.msra.gmra.mxu1 %vm227_vm1, %v171_v57 }
  0xd2   :  { %v210_v55 = vpop.permute.xlu2 %209 }
  0xd3   :  { %1245 = vperm.xlu0 %2348, %v947_v58   ;;  %1085 = vperm.xlu1 %2349, %v915_v59   ;;  %v205_v59 = vpop.permute.xlu0 %204 }
  0xd4   :  { %1170 = vperm.xlu2 %2350, %v932_v60  }
  0xd7   :  { %2147 = vmatmul.msk.f32.gmra.mxu1 %vm227_vm1, %v172_v61 }
  0xdb   :  { %1240 = vperm.xlu0 %2348, %v946_v62   ;;  %1080 = vperm.xlu1 %2349, %v914_v63  }
  0xdc   :  { %1165 = vperm.xlu2 %2350, %v931_v0  }
  0xdf   :  { %2148 = vmatmul.msk.f32.gmra.mxu1 %vm227_vm1, %v173_v1 }
  0xe3   :  { %1235 = vperm.xlu0 %2348, %v945_v2   ;;  %1075 = vperm.xlu1 %2349, %v913_v3   ;;  %v200_v2 = vpop.permute.xlu1 %199 }
  0xe4   :  { %1160 = vperm.xlu2 %2350, %v930_v4  }
  0xe7   :  { %2149 = vmatmul.msk.f32.gmra.mxu1 %vm227_vm1, %v174_v5  ;;  %v195_v5 = vpop.permute.xlu2 %194 }
  0xeb   :  { %1230 = vperm.xlu0 %2348, %v944_v6   ;;  %1070 = vperm.xlu1 %2349, %v912_v7  }
  0xec   :  { %1155 = vperm.xlu2 %2350, %v929_v8   ;;  %v190_v8 = vpop.permute.xlu0 %189 }
  0xef   :  { %2150 = vmatmul.msk.f32.gmra.mxu1 %vm227_vm1, %v175_v9 }
  0xf3   :  { %1225 = vperm.xlu0 %2348, %v943_v10   ;;  %1065 = vperm.xlu1 %2349, %v911_v11  }
  0xf4   :  { %1150 = vperm.xlu2 %2350, %v928_v12  }
  0xf7   :  { %2151 = vmatmul.msk.f32.gmra.mxu1 %vm227_vm1, %v176_v13  ;;  %v2154_v13 = vld [vmem:[%s3801_s3 + $0x40] sm:$0xff] }
  0xfb   :  { %1220 = vperm.xlu0 %2348, %v942_v14   ;;  %1060 = vperm.xlu1 %2349, %v910_v15   ;;  %v2155_v14 = vld [vmem:[%s3801_s3 + $0x48] sm:$0xff]  ;;  %v2156_v15 = vld [vmem:[%s3801_s3 + $0x50] sm:$0xff] }
  0xfc   :  { %1145 = vperm.xlu2 %2350, %v927_v16   ;;  %v2157_v16 = vld [vmem:[%s3801_s3 + $0x58] sm:$0xff] }
  0xff   :  { %2152 = vmatmul.msk.f32.gmra.mxu1 %vm227_vm1, %v177_v17  ;;  %v2158_v17 = vld [vmem:[%s3801_s3 + $0x60] sm:$0xff] }
 0x103   :  { %1215 = vperm.xlu0 %2348, %v941_v18   ;;  %1055 = vperm.xlu1 %2349, %v909_v19   ;;  %v2159_v18 = vld [vmem:[%s3801_s3 + $0x68] sm:$0xff]  ;;  %v2160_v19 = vld [vmem:[%s3801_s3 + $0x70] sm:$0xff] }
 0x104   :  { %1140 = vperm.xlu2 %2350, %v926_v20   ;;  %v2161_v20 = vld [vmem:[%s3801_s3 + $0x78] sm:$0xff] }
 0x107   :  { %2153 = vmatmul.msk.f32.gmra.mxu1 %vm227_vm1, %v178_v21 }
 0x10b   :  { %1210 = vperm.xlu0 %2348, %v940_v22   ;;  %1050 = vperm.xlu1 %2349, %v908_v23  }
 0x10c   :  { %1135 = vperm.xlu2 %2350, %v925_v24  }
 0x113   :  { %1205 = vperm.xlu0 %2348, %v939_v25   ;;  %1045 = vperm.xlu1 %2349, %v907_v26  }
 0x114   :  { %1130 = vperm.xlu2 %2350, %v924_v27   ;;  %v357_v27 = vpop.permute.xlu1 %356 }
 0x11b   :  { %1200 = vperm.xlu0 %2348, %v938_v28   ;;  %1040 = vperm.xlu1 %2349, %v906_v29   ;;  %v352_v28 = vpop.permute.xlu2 %351 }
 0x11c   :  { %1125 = vperm.xlu2 %2350, %v923_v30   ;;  %v347_v30 = vpop.permute.xlu0 %346 }
 0x123   :  { %1195 = vperm.xlu0 %2348, %v937_v31   ;;  %1035 = vperm.xlu1 %2349, %v905_v32   ;;  %v342_v31 = vpop.permute.xlu1 %341 }
 0x124   :  { %1120 = vperm.xlu2 %2350, %v922_v33  }
 0x12b   :  { %1115 = vperm.xlu0 %2348, %v921_v34   ;;  %1795 = vperm.xlu1 %2349, %v1773_v35   ;;  %v337_v35 = vpop.permute.xlu2 %336 }
 0x12c   :  { %1815 = vperm.xlu2 %2350, %v1777_v36  }
 0x133   :  { %1790 = vperm.xlu0 %2348, %v1772_v37   ;;  %1810 = vperm.xlu1 %2349, %v1776_v38  }
 0x134   :  { %1785 = vperm.xlu2 %2350, %v1771_v39  }
 0x13b   :  { %1805 = vperm.xlu0 %2348, %v1775_v40   ;;  %1780 = vperm.xlu1 %2349, %v1770_v41  }
 0x13c   :  { %1800 = vperm.xlu2 %2350, %v1774_v42   ;;  %v332_v42 = vpop.permute.xlu0 %331 }
 0x143   :  { %2080 = vperm.xlu0 %2348, %v2076_v43   ;;  %2085 = vperm.xlu1 %2349, %v2077_v44  }
 0x14c   :  { %v269_v45 = vpop.f32.mrf.mxu1 }
 0x14d   :  { %v270_v9 = vadd.f32 %v269_v45, %v190_v8  ;;  %v327_v45 = vpop.permute.xlu1 %326 }
 0x14f   :  { %v293_v12 = vmax.f32 %v270_v9, 0.0 }
 0x154   :  { %v272_v46 = vpop.f32.mrf.mxu1 }
 0x155   :  { %v273_v6 = vadd.f32 %v272_v46, %v195_v5 }
 0x157   :  { %v294_v11 = vmax.f32 %v273_v6, 0.0 }
 0x15c   :  { %v275_v47 = vpop.f32.mrf.mxu1 }
 0x15d   :  { %v276_v3 = vadd.f32 %v275_v47, %v200_v2 }
 0x15f   :  { %v295_v10 = vmax.f32 %v276_v3, 0.0  ;;  %v488_v3 = vpop.permute.xlu0 %487 }
 0x164   :  { %v278_v48 = vpop.f32.mrf.mxu1 }
 0x165   :  { %v279_v0 = vadd.f32 %v278_v48, %v205_v59  ;;  %v322_v48 = vpop.permute.xlu2 %321  ;;  %v2184_v59 = vld [vmem:[%s3801_s3 + $0xb0] sm:$0xff] }
 0x167   :  { %v296_v7 = vmax.f32 %v279_v0, 0.0 }
 0x16c   :  { %v281_v49 = vpop.f32.mrf.mxu1 }
 0x16d   :  { %v282_v62 = vadd.f32 %v281_v49, %v210_v55  ;;  %v2180_v55 = vld [vmem:[%s3801_s3 + $0x90] sm:$0xff]  ;;  %v478_v6 = vpop.permute.xlu2 %477 }
 0x16f   :  { %v297_v4 = vmax.f32 %v282_v62, 0.0 }
 0x174   :  { %v284_v50 = vpop.f32.mrf.mxu1 }
 0x175   :  { %v285_v60 = vadd.f32 %v284_v50, %v215_v54  ;;  %v2179_v54 = vld [vmem:[%s3801_s3 + $0x88] sm:$0xff] }
 0x177   :  { %v298_v1 = vmax.f32 %v285_v60, 0.0  ;;  %v2185_v60 = vld [vmem:[%s3801_s3 + $0xb8] sm:$0xff] }
 0x17c   :  { %v287_v53 = vpop.f32.mrf.mxu1 }
 0x17d   :  { %v288_v57 = vadd.f32 %v287_v53, %v220_v52  ;;  %v2178_v53 = vld [vmem:[%s3801_s3 + $0x80] sm:$0xff] }
 0x17f   :  { %v299_v63 = vmax.f32 %v288_v57, 0.0  ;;  %v2182_v57 = vld [vmem:[%s3801_s3 + $0xa0] sm:$0xff] }
 0x184   :  { %v290_v56 = vpop.f32.mrf.mxu1 }
 0x185   :  { %v291_v58 = vadd.f32 %v290_v56, %v225_v51  ;;  %v2181_v56 = vld [vmem:[%s3801_s3 + $0x98] sm:$0xff] }
 0x187   :  { %v300_v61 = vmax.f32 %v291_v58, 0.0  ;;  %v2183_v58 = vld [vmem:[%s3801_s3 + $0xa8] sm:$0xff] }
 0x189   :  { %391 = vmatpush.msra.mxu2 %v300_v61 }
 0x18b   :  { %392 = vmatpush.msra.mxu2 %v299_v63 }
 0x18d   :  { %393 = vmatpush.msra.mxu2 %v298_v1 }
 0x18f   :  { %394 = vmatpush.msra.mxu2 %v297_v4  ;;  %v483_v4 = vpop.permute.xlu1 %482 }
 0x191   :  { %395 = vmatpush.msra.mxu2 %v296_v7  ;;  %v473_v7 = vpop.permute.xlu0 %472 }
 0x193   :  { %396 = vmatpush.msra.mxu2 %v295_v10 }
 0x195   :  { %397 = vmatpush.msra.mxu2 %v294_v11 }
 0x197   :  { %398 = vmatpush.msra.mxu2 %v293_v12  ;;  %v468_v11 = vpop.permute.xlu1 %467 }
 0x198   :  { %2170 = vmatmul.msk.f32.vlgmr.msra.gmra.mxu2 %vm227_vm1, %v2154_v13 }
 0x1a0   :  { %2171 = vmatmul.msk.f32.gmra.mxu2 %vm227_vm1, %v2155_v14 }
 0x1a8   :  { %2172 = vmatmul.msk.f32.gmra.mxu2 %vm227_vm1, %v2156_v15 }
 0x1b0   :  { %2173 = vmatmul.msk.f32.gmra.mxu2 %vm227_vm1, %v2157_v16 }
 0x1b8   :  { %2174 = vmatmul.msk.f32.gmra.mxu2 %vm227_vm1, %v2158_v17 }
 0x1c0   :  { %2175 = vmatmul.msk.f32.gmra.mxu2 %vm227_vm1, %v2159_v18  ;;  %v463_v18 = vpop.permute.xlu2 %462 }
 0x1c8   :  { %2176 = vmatmul.msk.f32.gmra.mxu2 %vm227_vm1, %v2160_v19 }
 0x1d0   :  { %2177 = vmatmul.msk.f32.gmra.mxu2 %vm227_vm1, %v2161_v20 }
 0x21b   :  { %v400_v21 = vpop.f32.mrf.mxu2 }
 0x21c   :  { %v401_v49 = vadd.f32 %v400_v21, %v322_v48  ;;  %v458_v21 = vpop.permute.xlu0 %457 }
 0x21e   :  { %v424_v52 = vmax.f32 %v401_v49, 0.0 }
 0x223   :  { %v403_v22 = vpop.f32.mrf.mxu2 }
 0x224   :  { %v404_v46 = vadd.f32 %v403_v22, %v327_v45 }
 0x226   :  { %v425_v51 = vmax.f32 %v404_v46, 0.0 }
 0x22b   :  { %v406_v23 = vpop.f32.mrf.mxu2 }
 0x22c   :  { %v407_v43 = vadd.f32 %v406_v23, %v332_v42 }
 0x22e   :  { %v426_v50 = vmax.f32 %v407_v43, 0.0  ;;  %v619_v43 = vpop.permute.xlu2 %618 }
 0x233   :  { %v409_v24 = vpop.f32.mrf.mxu2 }
 0x234   :  { %v410_v40 = vadd.f32 %v409_v24, %v337_v35  ;;  %v453_v24 = vpop.permute.xlu1 %452  ;;  %v2208_v35 = vld [vmem:[%s3801_s3 + $0xf0] sm:$0xff] }
 0x236   :  { %v427_v47 = vmax.f32 %v410_v40, 0.0 }
 0x23b   :  { %v412_v25 = vpop.f32.mrf.mxu2 }
 0x23c   :  { %v413_v38 = vadd.f32 %v412_v25, %v342_v31  ;;  %v2204_v31 = vld [vmem:[%s3801_s3 + $0xd0] sm:$0xff]  ;;  %v609_v46 = vpop.permute.xlu1 %608 }
 0x23e   :  { %v428_v44 = vmax.f32 %v413_v38, 0.0 }
 0x243   :  { %v415_v26 = vpop.f32.mrf.mxu2 }
 0x244   :  { %v416_v36 = vadd.f32 %v415_v26, %v347_v30  ;;  %v2203_v30 = vld [vmem:[%s3801_s3 + $0xc8] sm:$0xff] }
 0x246   :  { %v429_v41 = vmax.f32 %v416_v36, 0.0  ;;  %v2209_v36 = vld [vmem:[%s3801_s3 + $0xf8] sm:$0xff] }
 0x24b   :  { %v418_v29 = vpop.f32.mrf.mxu2 }
 0x24c   :  { %v419_v33 = vadd.f32 %v418_v29, %v352_v28  ;;  %v2202_v29 = vld [vmem:[%s3801_s3 + $0xc0] sm:$0xff] }
 0x24e   :  { %v430_v39 = vmax.f32 %v419_v33, 0.0  ;;  %v2206_v33 = vld [vmem:[%s3801_s3 + $0xe0] sm:$0xff] }
 0x253   :  { %v421_v32 = vpop.f32.mrf.mxu2 }
 0x254   :  { %v422_v34 = vadd.f32 %v421_v32, %v357_v27  ;;  %v2205_v32 = vld [vmem:[%s3801_s3 + $0xd8] sm:$0xff] }
 0x256   :  { %v431_v37 = vmax.f32 %v422_v34, 0.0  ;;  %v2207_v34 = vld [vmem:[%s3801_s3 + $0xe8] sm:$0xff] }
 0x258   :  { %522 = vmatpush.msra.mxu3 %v431_v37 }
 0x25a   :  { %523 = vmatpush.msra.mxu3 %v430_v39 }
 0x25c   :  { %524 = vmatpush.msra.mxu3 %v429_v41 }
 0x25e   :  { %525 = vmatpush.msra.mxu3 %v428_v44  ;;  %v614_v44 = vpop.permute.xlu0 %613 }
 0x260   :  { %526 = vmatpush.msra.mxu3 %v427_v47  ;;  %v604_v47 = vpop.permute.xlu2 %603 }
 0x262   :  { %527 = vmatpush.msra.mxu3 %v426_v50 }
 0x264   :  { %528 = vmatpush.msra.mxu3 %v425_v51 }
 0x266   :  { %529 = vmatpush.msra.mxu3 %v424_v52  ;;  %v599_v51 = vpop.permute.xlu0 %598 }
 0x267   :  { %2194 = vmatmul.msk.f32.vlgmr.msra.gmra.mxu3 %vm227_vm1, %v2178_v53 }
 0x26f   :  { %2195 = vmatmul.msk.f32.gmra.mxu3 %vm227_vm1, %v2179_v54 }
 0x277   :  { %2196 = vmatmul.msk.f32.gmra.mxu3 %vm227_vm1, %v2180_v55 }
 0x27f   :  { %2197 = vmatmul.msk.f32.gmra.mxu3 %vm227_vm1, %v2181_v56 }
 0x287   :  { %2198 = vmatmul.msk.f32.gmra.mxu3 %vm227_vm1, %v2182_v57 }
 0x28f   :  { %2199 = vmatmul.msk.f32.gmra.mxu3 %vm227_vm1, %v2183_v58  ;;  %v594_v58 = vpop.permute.xlu1 %593 }
 0x297   :  { %2200 = vmatmul.msk.f32.gmra.mxu3 %vm227_vm1, %v2184_v59 }
 0x29f   :  { %2201 = vmatmul.msk.f32.gmra.mxu3 %vm227_vm1, %v2185_v60 }
 0x2ea   :  { %v531_v61 = vpop.f32.mrf.mxu3 }
 0x2eb   :  { %v532_v25 = vadd.f32 %v531_v61, %v453_v24  ;;  %v589_v61 = vpop.permute.xlu2 %588 }
 0x2ed   :  { %v555_v28 = vmax.f32 %v532_v25, 0.0 }
 0x2f2   :  { %v534_v62 = vpop.f32.mrf.mxu3 }
 0x2f3   :  { %v535_v22 = vadd.f32 %v534_v62, %v458_v21 }
 0x2f5   :  { %v556_v27 = vmax.f32 %v535_v22, 0.0 }
 0x2fa   :  { %v537_v63 = vpop.f32.mrf.mxu3 }
 0x2fb   :  { %v538_v19 = vadd.f32 %v537_v63, %v463_v18 }
 0x2fd   :  { %v557_v26 = vmax.f32 %v538_v19, 0.0  ;;  %v750_v19 = vpop.permute.xlu1 %749 }
 0x302   :  { %v540_v0 = vpop.f32.mrf.mxu3 }
 0x303   :  { %v541_v16 = vadd.f32 %v540_v0, %v468_v11  ;;  %v584_v0 = vpop.permute.xlu0 %583  ;;  %v2232_v11 = vld [vmem:[%s3801_s3 + $0x130] sm:$0xff] }
 0x305   :  { %v558_v23 = vmax.f32 %v541_v16, 0.0 }
 0x30a   :  { %v543_v1 = vpop.f32.mrf.mxu3 }
 0x30b   :  { %v544_v14 = vadd.f32 %v543_v1, %v473_v7  ;;  %v2228_v7 = vld [vmem:[%s3801_s3 + $0x110] sm:$0xff]  ;;  %v740_v22 = vpop.permute.xlu0 %739 }
 0x30d   :  { %v559_v20 = vmax.f32 %v544_v14, 0.0 }
 0x312   :  { %v546_v2 = vpop.f32.mrf.mxu3 }
 0x313   :  { %v547_v12 = vadd.f32 %v546_v2, %v478_v6  ;;  %v2227_v6 = vld [vmem:[%s3801_s3 + $0x108] sm:$0xff] }
 0x315   :  { %v560_v17 = vmax.f32 %v547_v12, 0.0  ;;  %v2233_v12 = vld [vmem:[%s3801_s3 + $0x138] sm:$0xff] }
 0x31a   :  { %v549_v5 = vpop.f32.mrf.mxu3 }
 0x31b   :  { %v550_v9 = vadd.f32 %v549_v5, %v483_v4  ;;  %v2226_v5 = vld [vmem:[%s3801_s3 + $0x100] sm:$0xff] }
 0x31d   :  { %v561_v15 = vmax.f32 %v550_v9, 0.0  ;;  %v2230_v9 = vld [vmem:[%s3801_s3 + $0x120] sm:$0xff] }
 0x322   :  { %v552_v8 = vpop.f32.mrf.mxu3 }
 0x323   :  { %v553_v10 = vadd.f32 %v552_v8, %v488_v3  ;;  %v2229_v8 = vld [vmem:[%s3801_s3 + $0x118] sm:$0xff] }
 0x325   :  { %v562_v13 = vmax.f32 %v553_v10, 0.0  ;;  %v2231_v10 = vld [vmem:[%s3801_s3 + $0x128] sm:$0xff] }
 0x327   :  { %653 = vmatpush.msrb.mxu0 %v562_v13 }
 0x329   :  { %654 = vmatpush.msrb.mxu0 %v561_v15 }
 0x32b   :  { %655 = vmatpush.msrb.mxu0 %v560_v17 }
 0x32d   :  { %656 = vmatpush.msrb.mxu0 %v559_v20  ;;  %v745_v20 = vpop.permute.xlu2 %744 }
 0x32f   :  { %657 = vmatpush.msrb.mxu0 %v558_v23  ;;  %v735_v23 = vpop.permute.xlu1 %734 }
 0x331   :  { %658 = vmatpush.msrb.mxu0 %v557_v26 }
 0x333   :  { %659 = vmatpush.msrb.mxu0 %v556_v27 }
 0x335   :  { %660 = vmatpush.msrb.mxu0 %v555_v28  ;;  %v730_v27 = vpop.permute.xlu2 %729 }
 0x336   :  { %2218 = vmatmul.msk.f32.vlgmr.msrb.gmra.mxu0 %vm227_vm1, %v2202_v29 }
 0x33e   :  { %2219 = vmatmul.msk.f32.gmra.mxu0 %vm227_vm1, %v2203_v30 }
 0x346   :  { %2220 = vmatmul.msk.f32.gmra.mxu0 %vm227_vm1, %v2204_v31 }
 0x34e   :  { %2221 = vmatmul.msk.f32.gmra.mxu0 %vm227_vm1, %v2205_v32 }
 0x356   :  { %2222 = vmatmul.msk.f32.gmra.mxu0 %vm227_vm1, %v2206_v33 }
 0x35e   :  { %2223 = vmatmul.msk.f32.gmra.mxu0 %vm227_vm1, %v2207_v34  ;;  %v725_v34 = vpop.permute.xlu0 %724 }
 0x366   :  { %2224 = vmatmul.msk.f32.gmra.mxu0 %vm227_vm1, %v2208_v35 }
 0x36e   :  { %2225 = vmatmul.msk.f32.gmra.mxu0 %vm227_vm1, %v2209_v36 }
 0x3b3   :  { %v662_v37 = vpop.f32.mrf.mxu0 }
 0x3b4   :  { %v663_v1 = vadd.f32 %v662_v37, %v584_v0  ;;  %v720_v37 = vpop.permute.xlu1 %719  ;;  %v851_v0 = vld [vmem:[%s3803_s5 + $0xd0] sm:$0xff] }
 0x3b6   :  { %v686_v4 = vmax.f32 %v663_v1, 0.0  ;;  %v880_v1 = vld [vmem:[%s3803_s5 + $0x1b8] sm:$0xff] }
 0x3bb   :  { %v665_v38 = vpop.f32.mrf.mxu0 }
 0x3bc   :  { %v666_v62 = vadd.f32 %v665_v38, %v589_v61  ;;  %v3267_v61 = vpop.permute.xlu1 %1025 }
 0x3be   :  { %v687_v3 = vmax.f32 %v666_v62, 0.0  ;;  %v829_v62 = vld [vmem:[%s3803_s5 + $0x20] sm:$0xff] }
 0x3c3   :  { %v668_v39 = vpop.f32.mrf.mxu0 }
 0x3c4   :  { %v669_v59 = vadd.f32 %v668_v39, %v594_v58  ;;  %v837_v58 = vld [vmem:[%s3803_s5 + $0x60] sm:$0xff] }
 0x3c6   :  { %v688_v2 = vmax.f32 %v669_v59, 0.0  ;;  %v850_v59 = vld [vmem:[%s3803_s5 + $0xc8] sm:$0xff] }
 0x3cb   :  { %v671_v40 = vpop.f32.mrf.mxu0 }
 0x3cc   :  { %v672_v56 = vadd.f32 %v671_v40, %v599_v51  ;;  %v715_v40 = vpop.permute.xlu2 %714  ;;  %v848_v51 = vld [vmem:[%s3803_s5 + $0xb8] sm:$0xff] }
 0x3ce   :  { %v689_v63 = vmax.f32 %v672_v56, 0.0  ;;  %v878_v56 = vld [vmem:[%s3803_s5 + $0x1a8] sm:$0xff] }
 0x3d3   :  { %v674_v41 = vpop.f32.mrf.mxu0 }
 0x3d4   :  { %v675_v54 = vadd.f32 %v674_v41, %v604_v47  ;;  %v847_v47 = vld [vmem:[%s3803_s5 + $0xb0] sm:$0xff] }
 0x3d6   :  { %v690_v60 = vmax.f32 %v675_v54, 0.0  ;;  %v836_v54 = vld [vmem:[%s3803_s5 + $0x58] sm:$0xff] }
 0x3db   :  { %v677_v42 = vpop.f32.mrf.mxu0 }
 0x3dc   :  { %v678_v52 = vadd.f32 %v677_v42, %v609_v46  ;;  %v834_v46 = vld [vmem:[%s3803_s5 + $0x48] sm:$0xff] }
 0x3de   :  { %v691_v57 = vmax.f32 %v678_v52, 0.0  ;;  %v877_v52 = vld [vmem:[%s3803_s5 + $0x1a0] sm:$0xff] }
 0x3e3   :  { %v680_v45 = vpop.f32.mrf.mxu0 }
 0x3e4   :  { %v681_v49 = vadd.f32 %v680_v45, %v614_v44  ;;  %v825_v45 = vld [vmem:[%s3803_s5] sm:$0xff] }
 0x3e6   :  { %v692_v55 = vmax.f32 %v681_v49, 0.0  ;;  %v826_v49 = vld [vmem:[%s3803_s5 + $0x8] sm:$0xff] }
 0x3eb   :  { %v683_v48 = vpop.f32.mrf.mxu0 }
 0x3ec   :  { %v684_v50 = vadd.f32 %v683_v48, %v619_v43  ;;  %v876_v48 = vld [vmem:[%s3803_s5 + $0x198] sm:$0xff] }
 0x3ee   :  { %v693_v53 = vmax.f32 %v684_v50, 0.0  ;;  %v835_v50 = vld [vmem:[%s3803_s5 + $0x50] sm:$0xff] }
 0x3f0   :  { %784 = vmatpush.msrb.mxu1 %v693_v53  ;;  %v827_v53 = vld [vmem:[%s3803_s5 + $0x10] sm:$0xff] }
 0x3f2   :  { %785 = vmatpush.msrb.mxu1 %v692_v55  ;;  %v849_v55 = vld [vmem:[%s3803_s5 + $0xc0] sm:$0xff] }
 0x3f4   :  { %786 = vmatpush.msrb.mxu1 %v691_v57  ;;  %v828_v57 = vld [vmem:[%s3803_s5 + $0x18] sm:$0xff] }
 0x3f6   :  { %787 = vmatpush.msrb.mxu1 %v690_v60  ;;  %v879_v60 = vld [vmem:[%s3803_s5 + $0x1b0] sm:$0xff] }
 0x3f8   :  { %788 = vmatpush.msrb.mxu1 %v689_v63  ;;  %v838_v63 = vld [vmem:[%s3803_s5 + $0x68] sm:$0xff] }
 0x3fa   :  { %789 = vmatpush.msrb.mxu1 %v688_v2  ;;  %v3285_v2 = vpop.permute.xlu1 %1010 }
 0x3fc   :  { %790 = vmatpush.msrb.mxu1 %v687_v3  ;;  %v830_v3 = vld [vmem:[%s3803_s5 + $0x28] sm:$0xff] }
 0x3fe   :  { %791 = vmatpush.msrb.mxu1 %v686_v4  ;;  %v839_v4 = vld [vmem:[%s3803_s5 + $0x70] sm:$0xff] }
 0x3ff   :  { %2242 = vmatmul.msk.f32.vlgmr.msrb.gmra.mxu1 %vm227_vm1, %v2226_v5  ;;  %v852_v5 = vld [vmem:[%s3803_s5 + $0xd8] sm:$0xff] }
 0x407   :  { %2243 = vmatmul.msk.f32.gmra.mxu1 %vm227_vm1, %v2227_v6  ;;  %v881_v6 = vld [vmem:[%s3803_s5 + $0x1c0] sm:$0xff] }
 0x40f   :  { %2244 = vmatmul.msk.f32.gmra.mxu1 %vm227_vm1, %v2228_v7  ;;  %v831_v7 = vld [vmem:[%s3803_s5 + $0x30] sm:$0xff] }
 0x417   :  { %2245 = vmatmul.msk.f32.gmra.mxu1 %vm227_vm1, %v2229_v8  ;;  %v840_v8 = vld [vmem:[%s3803_s5 + $0x78] sm:$0xff] }
 0x41f   :  { %2246 = vmatmul.msk.f32.gmra.mxu1 %vm227_vm1, %v2230_v9  ;;  %v853_v9 = vld [vmem:[%s3803_s5 + $0xe0] sm:$0xff] }
 0x427   :  { %2247 = vmatmul.msk.f32.gmra.mxu1 %vm227_vm1, %v2231_v10  ;;  %v882_v10 = vld [vmem:[%s3803_s5 + $0x1c8] sm:$0xff] }
 0x42f   :  { %2248 = vmatmul.msk.f32.gmra.mxu1 %vm227_vm1, %v2232_v11  ;;  %v3315_v11 = vpop.permute.xlu1 %995 }
 0x437   :  { %2249 = vmatmul.msk.f32.gmra.mxu1 %vm227_vm1, %v2233_v12  ;;  %v832_v12 = vld [vmem:[%s3803_s5 + $0x38] sm:$0xff] }
 0x47c   :  { %v793_v13 = vpop.f32.mrf.mxu1 }
 0x47d   :  { %v794_v41 = vadd.f32 %v793_v13, %v715_v40  ;;  %v841_v13 = vld [vmem:[%s3803_s5 + $0x80] sm:$0xff]  ;;  %v846_v40 = vld [vmem:[%s3803_s5 + $0xa8] sm:$0xff] }
 0x47f   :  { %v3193_v44 = vmax.f32 %v794_v41, 0.0  ;;  %v859_v41 = vld [vmem:[%s3803_s5 + $0x110] sm:$0xff] }
 0x484   :  { %v796_v14 = vpop.f32.mrf.mxu1 }
 0x485   :  { %v797_v38 = vadd.f32 %v796_v14, %v720_v37  ;;  %v854_v14 = vld [vmem:[%s3803_s5 + $0xe8] sm:$0xff] }
 0x487   :  { %v3187_v43 = vmax.f32 %v797_v38, 0.0 }
 0x489   :  { %3826 = vst [vmem:[#allocation11_spill] sm:$0xff] %v3187_v43 }
 0x48c   :  { %v799_v15 = vpop.f32.mrf.mxu1 }
 0x48d   :  { %v800_v35 = vadd.f32 %v799_v15, %v725_v34  ;;  %v883_v15 = vld [vmem:[%s3803_s5 + $0x1d0] sm:$0xff]  ;;  %v858_v34 = vld [vmem:[%s3803_s5 + $0x108] sm:$0xff] }
 0x48f   :  { %v3181_v42 = vmax.f32 %v800_v35, 0.0  ;;  %v887_v35 = vld [vmem:[%s3803_s5 + $0x1f0] sm:$0xff] }
 0x491   :  { %3825 = vst [vmem:[#allocation10_spill] sm:$0xff] %v3181_v42 }
 0x494   :  { %v802_v16 = vpop.f32.mrf.mxu1 }
 0x495   :  { %v803_v32 = vadd.f32 %v802_v16, %v730_v27  ;;  %v3335_v16 = vpop.permute.xlu1 %980  ;;  %v844_v27 = vld [vmem:[%s3803_s5 + $0x98] sm:$0xff] }
 0x497   :  { %v3175_v39 = vmax.f32 %v803_v32, 0.0  ;;  %v845_v32 = vld [vmem:[%s3803_s5 + $0xa0] sm:$0xff] }
 0x499   :  { %3824 = vst [vmem:[#allocation9_spill] sm:$0xff] %v3175_v39 }
 0x49c   :  { %v805_v17 = vpop.f32.mrf.mxu1 }
 0x49d   :  { %v806_v30 = vadd.f32 %v805_v17, %v735_v23  ;;  %v833_v17 = vld [vmem:[%s3803_s5 + $0x40] sm:$0xff]  ;;  %v856_v23 = vld [vmem:[%s3803_s5 + $0xf8] sm:$0xff] }
 0x49f   :  { %v3169_v36 = vmax.f32 %v806_v30, 0.0  ;;  %v886_v30 = vld [vmem:[%s3803_s5 + $0x1e8] sm:$0xff] }
 0x4a1   :  { %3823 = vst [vmem:[#allocation8_spill] sm:$0xff] %v3169_v36 }
 0x4a4   :  { %v808_v18 = vpop.f32.mrf.mxu1 }
 0x4a5   :  { %v809_v28 = vadd.f32 %v808_v18, %v740_v22  ;;  %v842_v18 = vld [vmem:[%s3803_s5 + $0x88] sm:$0xff]  ;;  %v843_v22 = vld [vmem:[%s3803_s5 + $0x90] sm:$0xff] }
 0x4a7   :  { %v3163_v33 = vmax.f32 %v809_v28, 0.0  ;;  %v857_v28 = vld [vmem:[%s3803_s5 + $0x100] sm:$0xff] }
 0x4a9   :  { %3822 = vst [vmem:[#allocation7_spill] sm:$0xff] %v3163_v33 }
 0x4ac   :  { %v811_v21 = vpop.f32.mrf.mxu1 }
 0x4ad   :  { %v812_v25 = vadd.f32 %v811_v21, %v745_v20  ;;  %v884_v20 = vld [vmem:[%s3803_s5 + $0x1d8] sm:$0xff]  ;;  %v3355_v21 = vpop.permute.xlu1 %965 }
 0x4af   :  { %v3157_v31 = vmax.f32 %v812_v25, 0.0  ;;  %v3369_v25 = vpop.permute.xlu0 %1030 }
 0x4b1   :  { %3821 = vst [vmem:[#allocation6_spill] sm:$0xff] %v3157_v31 }
 0x4b4   :  { %v814_v24 = vpop.f32.mrf.mxu1 }
 0x4b5   :  { %v815_v26 = vadd.f32 %v814_v24, %v750_v19  ;;  %v855_v19 = vld [vmem:[%s3803_s5 + $0xf0] sm:$0xff]  ;;  %v885_v24 = vld [vmem:[%s3803_s5 + $0x1e0] sm:$0xff] }
 0x4b7   :  { %v3155_v29 = vmax.f32 %v815_v26, 0.0  ;;  %v3371_v26 = vpop.permute.xlu1 %1270  ;;  %v3394_v37 = vpop.permute.xlu0 %1015 }
 0x4b9   :  { %3820 = vst [vmem:[#allocation5_spill] sm:$0xff] %v3155_v29  ;;  %1473 = vmatpush.msra.mxu0 %v3155_v29  ;;  %2320 = vmatpush.msra.mxu1 %v3155_v29 }
 0x4ba   :  { %2321 = vmatpush.msrb.mxu2 %v3155_v29  ;;  %2322 = vmatpush.msrb.mxu3 %v3155_v29  ;;  %v869_v29 = vld [vmem:[%s3803_s5 + $0x160] sm:$0xff] }
 0x4bb   :  { %1474 = vmatpush.msra.mxu0 %v3157_v31  ;;  %2323 = vmatpush.msra.mxu1 %v3157_v31 }
 0x4bc   :  { %2324 = vmatpush.msrb.mxu2 %v3157_v31  ;;  %2325 = vmatpush.msrb.mxu3 %v3157_v31 }
 0x4bd   :  { %1475 = vmatpush.msra.mxu0 %v3163_v33  ;;  %2326 = vmatpush.msra.mxu1 %v3163_v33 }
 0x4be   :  { %2327 = vmatpush.msrb.mxu2 %v3163_v33  ;;  %2328 = vmatpush.msrb.mxu3 %v3163_v33 }
 0x4bf   :  { %1476 = vmatpush.msra.mxu0 %v3169_v36  ;;  %2329 = vmatpush.msra.mxu1 %v3169_v36  ;;  %v3396_v38 = vpop.permute.xlu1 %1105 }
 0x4c0   :  { %2330 = vmatpush.msrb.mxu2 %v3169_v36  ;;  %2331 = vmatpush.msrb.mxu3 %v3169_v36 }
 0x4c1   :  { %1477 = vmatpush.msra.mxu0 %v3175_v39  ;;  %2332 = vmatpush.msra.mxu1 %v3175_v39 }
 0x4c2   :  { %2333 = vmatpush.msrb.mxu2 %v3175_v39  ;;  %2334 = vmatpush.msrb.mxu3 %v3175_v39 }
 0x4c3   :  { %1478 = vmatpush.msra.mxu0 %v3181_v42  ;;  %2335 = vmatpush.msra.mxu1 %v3181_v42 }
 0x4c4   :  { %2336 = vmatpush.msrb.mxu2 %v3181_v42  ;;  %2337 = vmatpush.msrb.mxu3 %v3181_v42 }
 0x4c5   :  { %1479 = vmatpush.msra.mxu0 %v3187_v43  ;;  %2338 = vmatpush.msra.mxu1 %v3187_v43 }
 0x4c6   :  { %2339 = vmatpush.msrb.mxu2 %v3187_v43  ;;  %2340 = vmatpush.msrb.mxu3 %v3187_v43 }
 0x4c7   :  { %1480 = vmatpush.msra.mxu0 %v3193_v44  ;;  %2341 = vmatpush.msra.mxu1 %v3193_v44 }
 0x4c8   :  { %2342 = vmatpush.msrb.mxu2 %v3193_v44  ;;  %2343 = vmatpush.msrb.mxu3 %v3193_v44 }
 0x4c9   :  { %2250 = vmatmul.msk.f32.vlgmr.msra.gmra.mxu0 %vm227_vm1, %v825_v45  ;;  %2259 = vmatmul.msk.f32.vlgmr.msra.gmra.mxu1 %vm227_vm1, %v834_v46  ;;  %v888_v45 = vld [vmem:[%s3803_s5 + $0x1f8] sm:$0xff]  ;;  %v3411_v46 = vpop.permute.xlu0 %1000 }
 0x4ca   :  { %2272 = vmatmul.msk.f32.vlgmr.msrb.gmra.mxu2 %vm227_vm1, %v847_v47  ;;  %2301 = vmatmul.msk.f32.vlgmr.msrb.gmra.mxu3 %vm227_vm1, %v876_v48  ;;  %v3413_v47 = vpop.permute.xlu1 %1100  ;;  %v860_v48 = vld [vmem:[%s3803_s5 + $0x118] sm:$0xff] }
 0x4d1   :  { %2251 = vmatmul.msk.f32.gmra.mxu0 %vm227_vm1, %v826_v49  ;;  %2260 = vmatmul.msk.f32.gmra.mxu1 %vm227_vm1, %v835_v50  ;;  %v3421_v49 = vpop.permute.xlu0 %985 }
 0x4d2   :  { %2273 = vmatmul.msk.f32.gmra.mxu2 %vm227_vm1, %v848_v51  ;;  %2302 = vmatmul.msk.f32.gmra.mxu3 %vm227_vm1, %v877_v52  ;;  %v3423_v50 = vpop.permute.xlu1 %1095  ;;  %v861_v51 = vld [vmem:[%s3803_s5 + $0x120] sm:$0xff] }
 0x4d9   :  { %2252 = vmatmul.msk.f32.gmra.mxu0 %vm227_vm1, %v827_v53  ;;  %2261 = vmatmul.msk.f32.gmra.mxu1 %vm227_vm1, %v836_v54  ;;  %v3429_v52 = vpop.permute.xlu0 %970  ;;  %v862_v54 = vld [vmem:[%s3803_s5 + $0x128] sm:$0xff] }
 0x4da   :  { %2274 = vmatmul.msk.f32.gmra.mxu2 %vm227_vm1, %v849_v55  ;;  %2303 = vmatmul.msk.f32.gmra.mxu3 %vm227_vm1, %v878_v56  ;;  %v3431_v53 = vpop.permute.xlu1 %1090 }
 0x4e1   :  { %2253 = vmatmul.msk.f32.gmra.mxu0 %vm227_vm1, %v828_v57  ;;  %2262 = vmatmul.msk.f32.gmra.mxu1 %vm227_vm1, %v837_v58  ;;  %v863_v57 = vld [vmem:[%s3803_s5 + $0x130] sm:$0xff]  ;;  %v3444_v58 = vpop.permute.xlu0 %955 }
 0x4e2   :  { %2275 = vmatmul.msk.f32.gmra.mxu2 %vm227_vm1, %v850_v59  ;;  %2304 = vmatmul.msk.f32.gmra.mxu3 %vm227_vm1, %v879_v60  ;;  %v3446_v59 = vpop.permute.xlu1 %1085 }
 0x4e9   :  { %2254 = vmatmul.msk.f32.gmra.mxu0 %vm227_vm1, %v829_v62  ;;  %2263 = vmatmul.msk.f32.gmra.mxu1 %vm227_vm1, %v838_v63 }
 0x4ea   :  { %2276 = vmatmul.msk.f32.gmra.mxu2 %vm227_vm1, %v851_v0  ;;  %2305 = vmatmul.msk.f32.gmra.mxu3 %vm227_vm1, %v880_v1  ;;  %v864_v1 = vld [vmem:[%s3803_s5 + $0x138] sm:$0xff] }
 0x4f1   :  { %2255 = vmatmul.msk.f32.gmra.mxu0 %vm227_vm1, %v830_v3  ;;  %2264 = vmatmul.msk.f32.gmra.mxu1 %vm227_vm1, %v839_v4  ;;  %v3458_v3 = vpop.permute.xlu0 %1265  ;;  %v3460_v4 = vpop.permute.xlu1 %1080 }
 0x4f2   :  { %2277 = vmatmul.msk.f32.gmra.mxu2 %vm227_vm1, %v852_v5  ;;  %2306 = vmatmul.msk.f32.gmra.mxu3 %vm227_vm1, %v881_v6 }
 0x4f9   :  { %2256 = vmatmul.msk.f32.gmra.mxu0 %vm227_vm1, %v831_v7  ;;  %2265 = vmatmul.msk.f32.gmra.mxu1 %vm227_vm1, %v840_v8 }
 0x4fa   :  { %2278 = vmatmul.msk.f32.gmra.mxu2 %vm227_vm1, %v853_v9  ;;  %2307 = vmatmul.msk.f32.gmra.mxu3 %vm227_vm1, %v882_v10  ;;  %v865_v9 = vld [vmem:[%s3803_s5 + $0x140] sm:$0xff]  ;;  %v3473_v10 = vpop.permute.xlu0 %1260 }
 0x501   :  { %2257 = vmatmul.msk.f32.gmra.mxu0 %vm227_vm1, %v832_v12  ;;  %2266 = vmatmul.msk.f32.gmra.mxu1 %vm227_vm1, %v841_v13  ;;  %v3475_v12 = vpop.permute.xlu1 %1075 }
 0x502   :  { %2279 = vmatmul.msk.f32.gmra.mxu2 %vm227_vm1, %v854_v14  ;;  %2308 = vmatmul.msk.f32.gmra.mxu3 %vm227_vm1, %v883_v15 }
 0x509   :  { %2258 = vmatmul.msk.f32.gmra.mxu0 %vm227_vm1, %v833_v17  ;;  %2267 = vmatmul.msk.f32.gmra.mxu1 %vm227_vm1, %v842_v18  ;;  %v866_v18 = vld [vmem:[%s3803_s5 + $0x148] sm:$0xff] }
 0x50a   :  { %2280 = vmatmul.msk.f32.gmra.mxu2 %vm227_vm1, %v855_v19  ;;  %2309 = vmatmul.msk.f32.gmra.mxu3 %vm227_vm1, %v884_v20  ;;  %v1021_v19 = vpop.permute.xlu2 %1020 }
 0x511   :  { %2268 = vmatmul.msk.f32.gmra.mxu1 %vm227_vm1, %v843_v22 }
 0x512   :  { %2281 = vmatmul.msk.f32.gmra.mxu2 %vm227_vm1, %v856_v23  ;;  %2310 = vmatmul.msk.f32.gmra.mxu3 %vm227_vm1, %v885_v24 }
 0x519   :  { %2269 = vmatmul.msk.f32.gmra.mxu1 %vm227_vm1, %v844_v27  ;;  %v867_v27 = vld [vmem:[%s3803_s5 + $0x150] sm:$0xff] }
 0x51a   :  { %2282 = vmatmul.msk.f32.gmra.mxu2 %vm227_vm1, %v857_v28  ;;  %2311 = vmatmul.msk.f32.gmra.mxu3 %vm227_vm1, %v886_v30  ;;  %v3496_v28 = vpop.permute.xlu0 %1255  ;;  %v3498_v30 = vpop.permute.xlu1 %1070 }
 0x521   :  { %2270 = vmatmul.msk.f32.gmra.mxu1 %vm227_vm1, %v845_v32  ;;  %v1006_v32 = vpop.permute.xlu2 %1005 }
 0x522   :  { %2283 = vmatmul.msk.f32.gmra.mxu2 %vm227_vm1, %v858_v34  ;;  %2312 = vmatmul.msk.f32.gmra.mxu3 %vm227_vm1, %v887_v35 }
 0x529   :  { %2271 = vmatmul.msk.f32.gmra.mxu1 %vm227_vm1, %v846_v40 }
 0x52a   :  { %2284 = vmatmul.msk.f32.gmra.mxu2 %vm227_vm1, %v859_v41  ;;  %2313 = vmatmul.msk.f32.gmra.mxu3 %vm227_vm1, %v888_v45  ;;  %v868_v45 = vld [vmem:[%s3803_s5 + $0x158] sm:$0xff] }
 0x532   :  { %2285 = vmatmul.msk.f32.gmra.mxu2 %vm227_vm1, %v860_v48  ;;  %v3508_v48 = vpop.permute.xlu0 %1250 }
 0x53a   :  { %2286 = vmatmul.msk.f32.gmra.mxu2 %vm227_vm1, %v861_v51  ;;  %v3510_v51 = vpop.permute.xlu1 %1065 }
 0x542   :  { %2287 = vmatmul.msk.f32.gmra.mxu2 %vm227_vm1, %v862_v54  ;;  %v991_v54 = vpop.permute.xlu2 %990  ;;  %v3525_v42 = vpop.permute.xlu1 %1060 }
 0x546   :  { %v3437_v55 = vpop.f32.mrf.mxu0  ;;  %v3439_v56 = vpop.f32.mrf.mxu1 }
 0x54a   :  { %2288 = vmatmul.msk.f32.gmra.mxu2 %vm227_vm1, %v863_v57 }
 0x54d   :  { %v3449_v60 = vpop.f32.mrf.mxu2  ;;  %v3451_v62 = vpop.f32.mrf.mxu3 }
 0x54e   :  { %v3453_v63 = vpop.f32.mrf.mxu0  ;;  %v1512_v0 = vpop.f32.mrf.mxu1 }
 0x552   :  { %2289 = vmatmul.msk.f32.gmra.mxu2 %vm227_vm1, %v864_v1 }
 0x555   :  { %v3463_v5 = vpop.f32.mrf.mxu2  ;;  %v3465_v6 = vpop.f32.mrf.mxu3 }
 0x556   :  { %v3467_v7 = vpop.f32.mrf.mxu0  ;;  %v1515_v8 = vpop.f32.mrf.mxu1 }
 0x55a   :  { %2290 = vmatmul.msk.f32.gmra.mxu2 %vm227_vm1, %v865_v9 }
 0x55d   :  { %v3477_v13 = vpop.f32.mrf.mxu2  ;;  %v3479_v14 = vpop.f32.mrf.mxu3 }
 0x55e   :  { %v3481_v15 = vpop.f32.mrf.mxu0  ;;  %v1518_v17 = vpop.f32.mrf.mxu1 }
 0x55f   :  { %v1519_v33 = vadd.f32 %v1518_v17, %v3394_v37  ;;  %v1510_v37 = vadd.f32 %v3439_v56, %v3411_v46  ;;  %v3551_v56 = vpop.permute.xlu1 %1055 }
 0x562   :  { %2291 = vmatmul.msk.f32.gmra.mxu2 %vm227_vm1, %v866_v18 }
 0x565   :  { %v3487_v20 = vpop.f32.mrf.mxu2  ;;  %v3489_v22 = vpop.f32.mrf.mxu3 }
 0x566   :  { %v3491_v23 = vpop.f32.mrf.mxu0  ;;  %v1521_v24 = vpop.f32.mrf.mxu1 }
 0x567   :  { %v1522_v31 = vadd.f32 %v1521_v24, %v1021_v19  ;;  %v976_v19 = vpop.permute.xlu2 %975 }
 0x56a   :  { %2292 = vmatmul.msk.f32.gmra.mxu2 %vm227_vm1, %v867_v27 }
 0x56d   :  { %v3501_v34 = vpop.f32.mrf.mxu2  ;;  %v3503_v35 = vpop.f32.mrf.mxu3 }
 0x56e   :  { %v1497_v40 = vpop.f32.mrf.mxu0  ;;  %v1524_v41 = vpop.f32.mrf.mxu1 }
 0x56f   :  { %v1525_v39 = vadd.f32 %v1524_v41, %v3267_v61  ;;  %v1516_v61 = vadd.f32 %v1515_v8, %v3285_v2  ;;  %v1513_v41 = vadd.f32 %v1512_v0, %v1006_v32  ;;  %v871_v32 = vld [vmem:[%s3803_s5 + $0x170] sm:$0xff] }
 0x572   :  { %2293 = vmatmul.msk.f32.gmra.mxu2 %vm227_vm1, %v868_v45  ;;  %v3523_v45 = vpop.permute.xlu0 %1245 }
 0x575   :  { %v3513_v57 = vpop.f32.mrf.mxu2  ;;  %v3515_v1 = vpop.f32.mrf.mxu3 }
 0x576   :  { %v1500_v9 = vpop.f32.mrf.mxu0  ;;  %v1527_v18 = vpop.f32.mrf.mxu1 }
 0x577   :  { %v1528_v27 = vadd.f32 %v1527_v18, %v3369_v25 }
 0x579   :  { %2351 = vtanh.f32 %v1528_v27 }
 0x57a   :  { %2294 = vmatmul.msk.f32.gmra.mxu2 %vm227_vm1, %v869_v29  ;;  %2353 = vtanh.f32 %v1525_v39  ;;  %v870_v29 = vld [vmem:[%s3803_s5 + $0x168] sm:$0xff]  ;;  %v3549_v46 = vpop.permute.xlu0 %1240 }
 0x57b   :  { %2355 = vtanh.f32 %v1522_v31 }
 0x57c   :  { %2357 = vtanh.f32 %v1519_v33 }
 0x57d   :  { %v3528_v43 = vpop.f32.mrf.mxu2  ;;  %v3530_v25 = vpop.f32.mrf.mxu3  ;;  %2359 = vtanh.f32 %v1516_v61 }
 0x57e   :  { %v1503_v18 = vpop.f32.mrf.mxu0  ;;  %v3532_v36 = vpop.f32.mrf.mxu1  ;;  %2361 = vtanh.f32 %v1513_v41  ;;  %v1501_v41 = vadd.f32 %v1500_v9, %v3421_v49  ;;  %v872_v49 = vld [vmem:[%s3803_s5 + $0x178] sm:$0xff] }
 0x57f   :  { %v2352_v24 = vpop.eup %2351  ;;  %2363 = vtanh.f32 %v1510_v37  ;;  %v1504_v61 = vadd.f32 %v1503_v18, %v991_v54  ;;  %v1495_v54 = vadd.f32 %v3491_v23, %v976_v19  ;;  %v1489_v23 = vadd.f32 %v3467_v7, %v3355_v21 }
 0x580   :  { %1818 = vmatpush.msra.mxu3 %v2352_v24  ;;  %v2354_v39 = vpop.eup %2353  ;;  %v961_v24 = vpop.permute.xlu2 %960 }
 0x581   :  { %v2356_v17 = vpop.eup %2355  ;;  %v1486_v19 = vadd.f32 %v3453_v63, %v961_v24  ;;  %v873_v63 = vld [vmem:[%s3803_s5 + $0x180] sm:$0xff] }
 0x582   :  { %2295 = vmatmul.msk.f32.gmra.mxu2 %vm227_vm1, %v870_v29  ;;  %1819 = vmatpush.msra.mxu3 %v2354_v39  ;;  %v2358_v0 = vpop.eup %2357 }
 0x583   :  { %v2360_v29 = vpop.eup %2359 }
 0x584   :  { %1820 = vmatpush.msra.mxu3 %v2356_v17  ;;  %v2362_v39 = vpop.eup %2361 }
 0x585   :  { %v1569_v31 = vpop.f32.mrf.mxu2  ;;  %v3541_v2 = vpop.f32.mrf.mxu3 }
 0x586   :  { %v1506_v8 = vpop.f32.mrf.mxu0  ;;  %v3543_v27 = vpop.f32.mrf.mxu1  ;;  %1821 = vmatpush.msra.mxu3 %v2358_v0 }
 0x587   :  { %v1507_v33 = vadd.f32 %v1506_v8, %v3315_v11  ;;  %v1498_v11 = vadd.f32 %v1497_v40, %v3335_v16  ;;  %v2364_v37 = vpop.eup %2363  ;;  %v1492_v16 = vadd.f32 %v3481_v15, %v3429_v52  ;;  %v3566_v0 = vpop.permute.xlu0 %1235  ;;  %v1483_v52 = vadd.f32 %v3437_v55, %v3444_v58 }
 0x588   :  { %1822 = vmatpush.msra.mxu3 %v2360_v29  ;;  %v1570_v55 = vadd.f32 %v1569_v31, %v3413_v47 }
 0x589   :  { %2365 = vtanh.f32 %v1507_v33  ;;  %v3568_v33 = vpop.permute.xlu1 %1050 }
 0x58a   :  { %2296 = vmatmul.msk.f32.gmra.mxu2 %vm227_vm1, %v871_v32  ;;  %2367 = vtanh.f32 %v1504_v61  ;;  %1823 = vmatpush.msra.mxu3 %v2362_v39  ;;  %v1111_v61 = vpop.permute.xlu2 %1110 }
 0x58b   :  { %2369 = vtanh.f32 %v1501_v41 }
 0x58c   :  { %1824 = vmatpush.msra.mxu3 %v2364_v37  ;;  %2371 = vtanh.f32 %v1498_v11  ;;  %v1567_v11 = vadd.f32 %v3528_v43, %v3423_v50  ;;  %v1561_v43 = vadd.f32 %v3501_v34, %v3446_v59 }
 0x58d   :  { %v1572_v17 = vpop.f32.mrf.mxu2  ;;  %v3556_v8 = vpop.f32.mrf.mxu3  ;;  %2373 = vtanh.f32 %v1495_v54  ;;  %v1564_v54 = vadd.f32 %v3513_v57, %v3431_v53  ;;  %v874_v53 = vld [vmem:[%s3803_s5 + $0x188] sm:$0xff]  ;;  %v1738_v57 = vld [vmem:[%s3805_s7] sm:$0xff] }
 0x58e   :  { %v3559_v18 = vpop.f32.mrf.mxu1  ;;  %2375 = vtanh.f32 %v1492_v16  ;;  %v1573_v21 = vadd.f32 %v1572_v17, %v3396_v38 }
 0x58f   :  { %v2366_v9 = vpop.eup %2365  ;;  %2377 = vtanh.f32 %v1489_v23  ;;  %v3588_v37 = vpop.permute.xlu0 %1230  ;;  %v1558_v23 = vadd.f32 %v3487_v20, %v3460_v4 }
 0x590   :  { %1825 = vmatpush.msra.mxu3 %v2366_v9  ;;  %v2368_v40 = vpop.eup %2367  ;;  %2379 = vtanh.f32 %v1486_v19  ;;  %v1555_v19 = vadd.f32 %v3477_v13, %v3475_v12  ;;  %v1549_v12 = vadd.f32 %v3449_v60, %v3510_v51 }
 0x591   :  { %v2370_v32 = vpop.eup %2369  ;;  %v1046_v17 = vpop.permute.xlu1 %1045 }
 0x592   :  { %2297 = vmatmul.msk.f32.gmra.mxu2 %vm227_vm1, %v872_v49  ;;  %1826 = vmatpush.msra.mxu3 %v2368_v40  ;;  %v2372_v41 = vpop.eup %2371  ;;  %v3606_v34 = vpop.permute.xlu2 %1190 }
 0x593   :  { %v2374_v24 = vpop.eup %2373 }
 0x594   :  { %1827 = vmatpush.msra.mxu3 %v2370_v32  ;;  %v2376_v58 = vpop.eup %2375 }
 0x595   :  { %v1575_v15 = vpop.f32.mrf.mxu2  ;;  %v3576_v29 = vpop.f32.mrf.mxu3 }
 0x596   :  { %v1576_v7 = vadd.f32 %v1575_v15, %v1111_v61  ;;  %v3579_v39 = vpop.f32.mrf.mxu1  ;;  %1828 = vmatpush.msra.mxu3 %v2372_v41  ;;  %v2378_v38 = vpop.eup %2377  ;;  %v1552_v61 = vadd.f32 %v3463_v5, %v3498_v30  ;;  %v1742_v5 = vld [vmem:[%s3805_s7 + $0x20] sm:$0xff] }
 0x597   :  { %v2380_v47 = vpop.eup %2379  ;;  %v3615_v15 = vpop.permute.xlu0 %1225 }
 0x598   :  { %2381 = vtanh.f32 %v1576_v7  ;;  %1829 = vmatpush.msra.mxu3 %v2374_v24 }
 0x599   :  { %2383 = vtanh.f32 %v1483_v52  ;;  %v1041_v41 = vpop.permute.xlu1 %1040 }
 0x59a   :  { %2385 = vtanh.f32 %v1573_v21  ;;  %2298 = vmatmul.msk.f32.gmra.mxu2 %vm227_vm1, %v873_v63  ;;  %1830 = vmatpush.msra.mxu3 %v2376_v58  ;;  %v875_v21 = vld [vmem:[%s3803_s5 + $0x190] sm:$0xff]  ;;  %v3628_v24 = vpop.permute.xlu2 %1185 }
 0x59b   :  { %2387 = vtanh.f32 %v1570_v55  ;;  %v1540_v55 = vadd.f32 %v3579_v39, %v3568_v33  ;;  %v1534_v39 = vadd.f32 %v3543_v27, %v1041_v41  ;;  %v1660_v27 = vadd.f32 %v3556_v8, %v3508_v48  ;;  %v1750_v48 = vld [vmem:[%s3805_s7 + $0x60] sm:$0xff] }
 0x59c   :  { %1831 = vmatpush.msra.mxu3 %v2378_v38  ;;  %2389 = vtanh.f32 %v1567_v11  ;;  %v1537_v38 = vadd.f32 %v3559_v18, %v1046_v17 }
 0x59d   :  { %v3592_v31 = vpop.f32.mrf.mxu2  ;;  %v3594_v49 = vpop.f32.mrf.mxu3  ;;  %2391 = vtanh.f32 %v1564_v54 }
 0x59e   :  { %v2382_v9 = vpop.eup %2381  ;;  %v1542_v50 = vpop.f32.mrf.mxu1  ;;  %1832 = vmatpush.msra.mxu3 %v2380_v47  ;;  %2393 = vtanh.f32 %v1561_v43  ;;  %v1746_v47 = vld [vmem:[%s3805_s7 + $0x40] sm:$0xff] }
 0x59f   :  { %v2384_v16 = vpop.eup %2383  ;;  %1859 = vmatpush.msrb.mxu0 %v2382_v9  ;;  %2395 = vtanh.f32 %v1558_v23  ;;  %v1543_v60 = vadd.f32 %v1542_v50, %v3551_v56  ;;  %v1221_v33 = vpop.permute.xlu0 %1220  ;;  %v1666_v50 = vadd.f32 %v3594_v49, %v3473_v10 }
 0x5a0   :  { %v2386_v40 = vpop.eup %2385  ;;  %1833 = vmatpush.msra.mxu3 %v2384_v16  ;;  %2397 = vtanh.f32 %v1555_v19 }
 0x5a1   :  { %1860 = vmatpush.msrb.mxu0 %v2386_v40  ;;  %v2388_v59 = vpop.eup %2387  ;;  %1834 = vmatmul.f32.vlgmr.msra.gmra.mxu3 %v1738_v57  ;;  %2399 = vtanh.f32 %v1552_v61  ;;  %v1036_v43 = vpop.permute.xlu1 %1035  ;;  %v1754_v61 = vld [vmem:[%s3805_s7 + $0x80] sm:$0xff] }
 0x5a2   :  { %2299 = vmatmul.msk.f32.gmra.mxu2 %vm227_vm1, %v874_v53  ;;  %v2390_v32 = vpop.eup %2389  ;;  %2401 = vtanh.f32 %v1549_v12  ;;  %v3650_v49 = vpop.permute.xlu2 %1180  ;;  %v1657_v53 = vadd.f32 %v3541_v2, %v3523_v45  ;;  %v1651_v45 = vadd.f32 %v3515_v1, %v3566_v0  ;;  %v1739_v2 = vld [vmem:[%s3805_s7 + $0x8] sm:$0xff]  ;;  %v1645_v0 = vadd.f32 %v3489_v22, %v3615_v15 }
 0x5a3   :  { %1861 = vmatpush.msrb.mxu0 %v2388_v59  ;;  %v2392_v52 = vpop.eup %2391  ;;  %v1743_v22 = vld [vmem:[%s3805_s7 + $0x28] sm:$0xff] }
 0x5a4   :  { %v2394_v30 = vpop.eup %2393 }
 0x5a5   :  { %v3613_v4 = vpop.f32.mrf.mxu2  ;;  %v1668_v20 = vpop.f32.mrf.mxu3  ;;  %1862 = vmatpush.msrb.mxu0 %v2390_v32 }
 0x5a6   :  { %v1545_v13 = vpop.f32.mrf.mxu1  ;;  %v2396_v63 = vpop.eup %2395  ;;  %v1669_v54 = vadd.f32 %v1668_v20, %v3458_v3  ;;  %v1663_v3 = vadd.f32 %v3576_v29, %v3496_v28  ;;  %v1654_v29 = vadd.f32 %v3530_v25, %v3549_v46  ;;  %v1648_v25 = vadd.f32 %v3503_v35, %v3588_v37 }
 0x5a7   :  { %1863 = vmatpush.msrb.mxu0 %v2392_v52  ;;  %v1546_v7 = vadd.f32 %v1545_v13, %v3525_v42  ;;  %v2398_v51 = vpop.eup %2397  ;;  %v1216_v40 = vpop.permute.xlu0 %1215  ;;  %v1642_v35 = vadd.f32 %v3479_v14, %v1221_v33 }
 0x5a8   :  { %v2400_v42 = vpop.eup %2399  ;;  %v1639_v52 = vadd.f32 %v3465_v6, %v1216_v40  ;;  %v1758_v6 = vld [vmem:[%s3805_s7 + $0xa0] sm:$0xff] }
 0x5a9   :  { %1864 = vmatpush.msrb.mxu0 %v2394_v30  ;;  %1837 = vmatmul.f32.gmra.mxu3 %v1742_v5  ;;  %2403 = vtanh.f32 %v1546_v7  ;;  %v2402_v9 = vpop.eup %2401 }
 0x5aa   :  { %2300 = vmatmul.msk.f32.gmra.mxu2 %vm227_vm1, %v875_v21  ;;  %2405 = vtanh.f32 %v1543_v60  ;;  %v3670_v32 = vpop.permute.xlu2 %1175 }
 0x5ab   :  { %1865 = vmatpush.msrb.mxu0 %v2396_v63  ;;  %2407 = vtanh.f32 %v1540_v55  ;;  %v1751_v55 = vld [vmem:[%s3805_s7 + $0x68] sm:$0xff] }
 0x5ad   :  { %v3632_v58 = vpop.f32.mrf.mxu2  ;;  %v1671_v11 = vpop.f32.mrf.mxu3  ;;  %1866 = vmatpush.msrb.mxu0 %v2398_v51  ;;  %v1762_v51 = vld [vmem:[%s3805_s7 + $0xc0] sm:$0xff] }
 0x5ae   :  { %v1672_v56 = vadd.f32 %v1671_v11, %v3371_v26  ;;  %v1531_v26 = vadd.f32 %v3532_v36, %v1036_v43  ;;  %v1763_v43 = vld [vmem:[%s3805_s7 + $0xc8] sm:$0xff] }
 0x5af   :  { %1867 = vmatpush.msrb.mxu0 %v2400_v42  ;;  %v2404_v18 = vpop.eup %2403  ;;  %v1211_v15 = vpop.permute.xlu0 %1210 }
 0x5b0   :  { %2409 = vtanh.f32 %v1672_v56  ;;  %v2406_v17 = vpop.eup %2405  ;;  %v1636_v13 = vadd.f32 %v3451_v62, %v1211_v15  ;;  %v1747_v62 = vld [vmem:[%s3805_s7 + $0x48] sm:$0xff] }
 0x5b1   :  { %1868 = vmatpush.msrb.mxu0 %v2402_v9  ;;  %2411 = vtanh.f32 %v1537_v38  ;;  %1840 = vmatmul.f32.gmra.mxu3 %v1746_v47  ;;  %v2408_v10 = vpop.eup %2407  ;;  %v1766_v38 = vld [vmem:[%s3805_s7 + $0xe0] sm:$0xff]  ;;  %v1755_v56 = vld [vmem:[%s3805_s7 + $0x88] sm:$0xff] }
 0x5b2   :  { %2413 = vtanh.f32 %v1669_v54  ;;  %v1171_v5 = vpop.permute.xlu2 %1170  ;;  %v1759_v9 = vld [vmem:[%s3805_s7 + $0xa8] sm:$0xff] }
 0x5b3   :  { %1869 = vmatpush.msrb.mxu0 %v2404_v18  ;;  %2415 = vtanh.f32 %v1534_v39 }
 0x5b4   :  { %2417 = vtanh.f32 %v1666_v50 }
 0x5b5   :  { %v3648_v16 = vpop.f32.mrf.mxu2  ;;  %1870 = vmatpush.msrb.mxu0 %v2406_v17  ;;  %2419 = vtanh.f32 %v1531_v26  ;;  %v1767_v26 = vld [vmem:[%s3805_s7 + $0xe8] sm:$0xff] }
 0x5b6   :  { %v2410_v36 = vpop.eup %2409  ;;  %2421 = vtanh.f32 %v1663_v3 }
 0x5b7   :  { %1871 = vmatpush.msrb.mxu0 %v2408_v10  ;;  %v2412_v28 = vpop.eup %2411  ;;  %1941 = vmatpush.msrb.mxu3 %v2410_v36  ;;  %2423 = vtanh.f32 %v1660_v27 }
 0x5b8   :  { %v2414_v8 = vpop.eup %2413  ;;  %2425 = vtanh.f32 %v1657_v53 }
 0x5b9   :  { %1872 = vmatpush.msrb.mxu0 %v2412_v28  ;;  %v2416_v57 = vpop.eup %2415  ;;  %1942 = vmatpush.msrb.mxu3 %v2414_v8  ;;  %2427 = vtanh.f32 %v1654_v29 }
 0x5ba   :  { %v2418_v23 = vpop.eup %2417  ;;  %1843 = vmatmul.f32.gmra.mxu3 %v1750_v48  ;;  %2429 = vtanh.f32 %v1651_v45  ;;  %v1166_v11 = vpop.permute.xlu2 %1165 }
 0x5bb   :  { %1873 = vmatpush.msrb.mxu0 %v2416_v57  ;;  %v2420_v59 = vpop.eup %2419  ;;  %1943 = vmatpush.msrb.mxu3 %v2418_v23  ;;  %2431 = vtanh.f32 %v1648_v25  ;;  %v1206_v48 = vpop.permute.xlu0 %1205 }
 0x5bc   :  { %v2422_v19 = vpop.eup %2421  ;;  %2433 = vtanh.f32 %v1645_v0 }
 0x5bd   :  { %v3666_v46 = vpop.f32.mrf.mxu2  ;;  %1874 = vmatpush.msrb.mxu0 %v2420_v59  ;;  %1944 = vmatpush.msrb.mxu3 %v2422_v19  ;;  %v2424_v1 = vpop.eup %2423  ;;  %2435 = vtanh.f32 %v1642_v35 }
 0x5be   :  { %1875 = vmatmul.f32.vlgmr.msrb.gmra.mxu0 %v1739_v2  ;;  %v2426_v20 = vpop.eup %2425  ;;  %2437 = vtanh.f32 %v1639_v52 }
 0x5bf   :  { %1945 = vmatpush.msrb.mxu3 %v2424_v1  ;;  %v2428_v37 = vpop.eup %2427  ;;  %2439 = vtanh.f32 %v1636_v13 }
 0x5c0   :  { %v2430_v12 = vpop.eup %2429 }
 0x5c1   :  { %1946 = vmatpush.msrb.mxu3 %v2426_v20  ;;  %v2432_v14 = vpop.eup %2431 }
 0x5c2   :  { %1846 = vmatmul.f32.gmra.mxu3 %v1754_v61  ;;  %v2434_v21 = vpop.eup %2433  ;;  %v1161_v47 = vpop.permute.xlu2 %1160 }
 0x5c3   :  { %1947 = vmatpush.msrb.mxu3 %v2428_v37  ;;  %v2436_v30 = vpop.eup %2435  ;;  %v1201_v59 = vpop.permute.xlu0 %1200 }
 0x5c4   :  { %v2438_v7 = vpop.eup %2437 }
 0x5c5   :  { %v3681_v41 = vpop.f32.mrf.mxu2  ;;  %1948 = vmatpush.msrb.mxu3 %v2430_v12  ;;  %v2440_v60 = vpop.eup %2439 }
 0x5c6   :  { %1878 = vmatmul.f32.gmra.mxu0 %v1743_v22 }
 0x5c7   :  { %1949 = vmatpush.msrb.mxu3 %v2432_v14 }
 0x5c9   :  { %1950 = vmatpush.msrb.mxu3 %v2434_v21 }
 0x5ca   :  { %1849 = vmatmul.f32.gmra.mxu3 %v1758_v6  ;;  %v1156_v39 = vpop.permute.xlu2 %1155 }
 0x5cb   :  { %1951 = vmatpush.msrb.mxu3 %v2436_v30  ;;  %v1196_v22 = vpop.permute.xlu0 %1195 }
 0x5cd   :  { %v3689_v63 = vpop.f32.mrf.mxu2  ;;  %1952 = vmatpush.msrb.mxu3 %v2438_v7 }
 0x5ce   :  { %1881 = vmatmul.f32.gmra.mxu0 %v1747_v62 }
 0x5cf   :  { %1953 = vmatpush.msrb.mxu3 %v2440_v60 }
 0x5d2   :  { %1852 = vmatmul.f32.gmra.mxu3 %v1762_v51  ;;  %v1151_v18 = vpop.permute.xlu2 %1150 }
 0x5d5   :  { %v1599_v42 = vpop.f32.mrf.mxu2 }
 0x5d6   :  { %1884 = vmatmul.f32.gmra.mxu0 %v1751_v55 }
 0x5da   :  { %1855 = vmatmul.f32.gmra.mxu3 %v1766_v38  ;;  %v1146_v17 = vpop.permute.xlu2 %1145 }
 0x5db   :  { %v1597_v52 = vadd.f32 %v3689_v63, %v1146_v17  ;;  %v1757_v17 = vld [vmem:[%s3805_s7 + $0x98] sm:$0xff] }
 0x5dd   :  { %v1602_v54 = vpop.f32.mrf.mxu2 }
 0x5de   :  { %1887 = vmatmul.f32.gmra.mxu0 %v1755_v56 }
 0x5e2   :  { %v1141_v36 = vpop.permute.xlu2 %1140 }
 0x5e3   :  { %v1594_v12 = vadd.f32 %v3681_v41, %v1141_v36  ;;  %v1760_v36 = vld [vmem:[%s3805_s7 + $0xb0] sm:$0xff] }
 0x5e5   :  { %v1605_v33 = vpop.f32.mrf.mxu2 }
 0x5e6   :  { %1890 = vmatmul.f32.gmra.mxu0 %v1759_v9  ;;  %v1606_v61 = vadd.f32 %v1605_v33, %v1161_v47  ;;  %v1740_v9 = vld [vmem:[%s3805_s7 + $0x10] sm:$0xff] }
 0x5ea   :  { %v1136_v28 = vpop.permute.xlu2 %1135 }
 0x5eb   :  { %v1591_v14 = vadd.f32 %v3666_v46, %v1136_v28  ;;  %v1764_v28 = vld [vmem:[%s3805_s7 + $0xd0] sm:$0xff] }
 0x5ed   :  { %v1608_v50 = vpop.f32.mrf.mxu2 }
 0x5ee   :  { %1893 = vmatmul.f32.gmra.mxu0 %v1763_v43  ;;  %v1609_v1 = vadd.f32 %v1608_v50, %v1166_v11  ;;  %v1744_v43 = vld [vmem:[%s3805_s7 + $0x30] sm:$0xff]  ;;  %v1749_v50 = vld [vmem:[%s3805_s7 + $0x58] sm:$0xff] }
 0x5f2   :  { %v1131_v23 = vpop.permute.xlu2 %1130 }
 0x5f3   :  { %v1588_v6 = vadd.f32 %v3648_v16, %v1131_v23  ;;  %v1116_v16 = vpop.permute.xlu0 %1115 }
 0x5f5   :  { %v1611_v3 = vpop.f32.mrf.mxu2 }
 0x5f6   :  { %1896 = vmatmul.f32.gmra.mxu0 %v1767_v26  ;;  %v1612_v2 = vadd.f32 %v1611_v3, %v1171_v5  ;;  %v1753_v26 = vld [vmem:[%s3805_s7 + $0x78] sm:$0xff]  ;;  %v1752_v3 = vld [vmem:[%s3805_s7 + $0x70] sm:$0xff] }
 0x5fa   :  { %v1126_v20 = vpop.permute.xlu2 %1125 }
 0x5fb   :  { %v1585_v5 = vadd.f32 %v3632_v58, %v1126_v20  ;;  %v1579_v58 = vadd.f32 %v3592_v31, %v1116_v16  ;;  %v1741_v31 = vld [vmem:[%s3805_s7 + $0x18] sm:$0xff]  ;;  %v1796_v20 = vpop.permute.xlu1 %1795 }
 0x5fd   :  { %v1614_v27 = vpop.f32.mrf.mxu2 }
 0x5fe   :  { %v1615_v45 = vadd.f32 %v1614_v27, %v3670_v32  ;;  %v1600_v32 = vadd.f32 %v1599_v42, %v1151_v18  ;;  %v1748_v18 = vld [vmem:[%s3805_s7 + $0x50] sm:$0xff] }
 0x5ff   :  { %v1756_v27 = vld [vmem:[%s3805_s7 + $0x90] sm:$0xff] }
 0x602   :  { %v1121_v7 = vpop.permute.xlu2 %1120 }
 0x603   :  { %v1582_v60 = vadd.f32 %v3613_v4, %v1121_v7 }
 0x605   :  { %v1617_v10 = vpop.f32.mrf.mxu2 }
 0x606   :  { %v1618_v40 = vadd.f32 %v1617_v10, %v3650_v49  ;;  %v1761_v10 = vld [vmem:[%s3805_s7 + $0xb8] sm:$0xff] }
 0x60d   :  { %v1620_v53 = vpop.f32.mrf.mxu2 }
 0x60e   :  { %v1621_v29 = vadd.f32 %v1620_v53, %v3628_v24  ;;  %v1603_v24 = vadd.f32 %v1602_v54, %v1156_v39  ;;  %v1745_v39 = vld [vmem:[%s3805_s7 + $0x38] sm:$0xff] }
 0x60f   :  { %v1765_v53 = vld [vmem:[%s3805_s7 + $0xd8] sm:$0xff] }
 0x615   :  { %v1623_v8 = vpop.f32.mrf.mxu2 }
 0x616   :  { %v1624_v57 = vadd.f32 %v1623_v8, %v3606_v34  ;;  %v1769_v8 = vld [vmem:[%s3805_s7 + $0xf8] sm:$0xff] }
 0x618   :  { %2441 = vtanh.f32 %v1624_v57 }
 0x619   :  { %2443 = vtanh.f32 %v1621_v29  ;;  %v1768_v29 = vld [vmem:[%s3805_s7 + $0xf0] sm:$0xff] }
 0x61a   :  { %2445 = vtanh.f32 %v1618_v40 }
 0x61b   :  { %2447 = vtanh.f32 %v1615_v45 }
 0x61c   :  { %2449 = vtanh.f32 %v1612_v2 }
 0x61d   :  { %v1626_v19 = vpop.f32.mrf.mxu2  ;;  %2451 = vtanh.f32 %v1609_v1 }
 0x61e   :  { %v2442_v25 = vpop.eup %2441  ;;  %2453 = vtanh.f32 %v1606_v61  ;;  %v1627_v51 = vadd.f32 %v1626_v19, %v1196_v22  ;;  %v1811_v22 = vpop.permute.xlu1 %1810 }
 0x61f   :  { %1900 = vmatpush.msrb.mxu1 %v2442_v25  ;;  %v2444_v0 = vpop.eup %2443  ;;  %2455 = vtanh.f32 %v1603_v24 }
 0x620   :  { %v2446_v34 = vpop.eup %2445  ;;  %2457 = vtanh.f32 %v1600_v32 }
 0x621   :  { %1901 = vmatpush.msrb.mxu1 %v2444_v0  ;;  %v2448_v49 = vpop.eup %2447  ;;  %2459 = vtanh.f32 %v1597_v52 }
 0x622   :  { %v2450_v37 = vpop.eup %2449  ;;  %2461 = vtanh.f32 %v1594_v12 }
 0x623   :  { %1902 = vmatpush.msrb.mxu1 %v2446_v34  ;;  %v2452_v15 = vpop.eup %2451  ;;  %2463 = vtanh.f32 %v1591_v14  ;;  %v1791_v14 = vpop.permute.xlu0 %1790 }
 0x624   :  { %v2454_v13 = vpop.eup %2453  ;;  %2465 = vtanh.f32 %v1588_v6 }
 0x625   :  { %v1629_v35 = vpop.f32.mrf.mxu2  ;;  %1903 = vmatpush.msrb.mxu1 %v2448_v49  ;;  %v2456_v21 = vpop.eup %2455 }
 0x626   :  { %v2458_v62 = vpop.eup %2457  ;;  %v1630_v63 = vadd.f32 %v1629_v35, %v1201_v59  ;;  %v1816_v49 = vpop.permute.xlu2 %1815 }
 0x627   :  { %1904 = vmatpush.msrb.mxu1 %v2450_v37  ;;  %v2460_v46 = vpop.eup %2459 }
 0x628   :  { %v2462_v55 = vpop.eup %2461 }
 0x629   :  { %1905 = vmatpush.msrb.mxu1 %v2452_v15  ;;  %v2464_v11 = vpop.eup %2463 }
 0x62a   :  { %v2466_v42 = vpop.eup %2465 }
 0x62b   :  { %1906 = vmatpush.msrb.mxu1 %v2454_v13 }
 0x62d   :  { %v1632_v30 = vpop.f32.mrf.mxu2  ;;  %1907 = vmatpush.msrb.mxu1 %v2456_v21 }
 0x62e   :  { %v1633_v41 = vadd.f32 %v1632_v30, %v1206_v48  ;;  %v1835_v48 = vpop.f32.mrf.mxu3  ;;  %v1786_v52 = vpop.permute.xlu2 %1785 }
 0x62f   :  { %1908 = vmatpush.msrb.mxu1 %v2458_v62 }
 0x630   :  { %2467 = vtanh.f32 %v1633_v41 }
 0x631   :  { %2469 = vtanh.f32 %v1585_v5  ;;  %1909 = vmatpush.msrb.mxu1 %v2460_v46  ;;  %v1781_v5 = vpop.permute.xlu1 %1780 }
 0x632   :  { %2471 = vtanh.f32 %v1630_v63  ;;  %v1836_v30 = vadd.f32 %v1835_v48, %v1781_v5 }
 0x633   :  { %2473 = vtanh.f32 %v1582_v60  ;;  %1910 = vmatpush.msrb.mxu1 %v2462_v55 }
 0x634   :  { %2475 = vtanh.f32 %v1627_v51 }
 0x635   :  { %1911 = vmatpush.msrb.mxu1 %v2464_v11  ;;  %2477 = vtanh.f32 %v1579_v58  ;;  %v1806_v11 = vpop.permute.xlu0 %1805 }
 0x636   :  { %v2468_v38 = vpop.eup %2467  ;;  %v1838_v57 = vpop.f32.mrf.mxu3 }
 0x637   :  { %v2470_v4 = vpop.eup %2469  ;;  %1912 = vmatpush.msrb.mxu1 %v2466_v42  ;;  %1954 = vmatpush.msrb.mxu3 %v2468_v38  ;;  %v1801_v21 = vpop.permute.xlu2 %1800  ;;  %v1839_v42 = vadd.f32 %v1838_v57, %v1786_v52 }
 0x638   :  { %v2472_v56 = vpop.eup %2471 }
 0x639   :  { %v2474_v54 = vpop.eup %2473  ;;  %1913 = vmatpush.msrb.mxu1 %v2470_v4  ;;  %1955 = vmatpush.msrb.mxu3 %v2472_v56 }
 0x63a   :  { %v2476_v47 = vpop.eup %2475 }
 0x63b   :  { %1914 = vmatpush.msrb.mxu1 %v2474_v54  ;;  %1956 = vmatpush.msrb.mxu3 %v2476_v47  ;;  %v2478_v33 = vpop.eup %2477  ;;  %v1876_v59 = vpop.f32.mrf.mxu0 }
 0x63c   :  { %1957 = vmatmul.f32.vlgmr.msrb.gmra.mxu3 %v1741_v31  ;;  %v1877_v63 = vadd.f32 %v1876_v59, %v1836_v30 }
 0x63d   :  { %1915 = vmatpush.msrb.mxu1 %v2478_v33 }
 0x63e   :  { %1916 = vmatmul.f32.vlgmr.msrb.gmra.mxu1 %v1740_v9  ;;  %v1841_v40 = vpop.f32.mrf.mxu3 }
 0x643   :  { %v1879_v25 = vpop.f32.mrf.mxu0 }
 0x644   :  { %1960 = vmatmul.f32.gmra.mxu3 %v1745_v39  ;;  %v1880_v54 = vadd.f32 %v1879_v25, %v1839_v42 }
 0x646   :  { %1919 = vmatmul.f32.gmra.mxu1 %v1744_v43  ;;  %v3771_v23 = vpop.f32.mrf.mxu3 }
 0x647   :  { %v1845_v25 = vadd.f32 %v3771_v23, %v1796_v20 }
 0x64b   :  { %v1882_v61 = vpop.f32.mrf.mxu0 }
 0x64c   :  { %1963 = vmatmul.f32.gmra.mxu3 %v1749_v50 }
 0x64e   :  { %1922 = vmatmul.f32.gmra.mxu1 %v1748_v18  ;;  %v1847_v45 = vpop.f32.mrf.mxu3 }
 0x64f   :  { %v1848_v62 = vadd.f32 %v1847_v45, %v1801_v21 }
 0x653   :  { %v1885_v35 = vpop.f32.mrf.mxu0 }
 0x654   :  { %1966 = vmatmul.f32.gmra.mxu3 %v1753_v26  ;;  %v1842_v26 = vadd.f32 %v1841_v40, %v1791_v14 }
 0x656   :  { %1925 = vmatmul.f32.gmra.mxu1 %v1752_v3  ;;  %v1850_v2 = vpop.f32.mrf.mxu3 }
 0x657   :  { %v1851_v38 = vadd.f32 %v1850_v2, %v1806_v11 }
 0x65b   :  { %v1888_v12 = vpop.f32.mrf.mxu0 }
 0x65c   :  { %1969 = vmatmul.f32.gmra.mxu3 %v1757_v17  ;;  %v1889_v41 = vadd.f32 %v1888_v12, %v1848_v62 }
 0x65e   :  { %1928 = vmatmul.f32.gmra.mxu1 %v1756_v27  ;;  %v1853_v19 = vpop.f32.mrf.mxu3 }
 0x65f   :  { %v1854_v3 = vadd.f32 %v1853_v19, %v1811_v22 }
 0x663   :  { %v1891_v60 = vpop.f32.mrf.mxu0 }
 0x664   :  { %1972 = vmatmul.f32.gmra.mxu3 %v1761_v10  ;;  %v1892_v31 = vadd.f32 %v1891_v60, %v1851_v38 }
 0x666   :  { %1931 = vmatmul.f32.gmra.mxu1 %v1760_v36  ;;  %v3773_v1 = vpop.f32.mrf.mxu3  ;;  %v1883_v36 = vadd.f32 %v1882_v61, %v1842_v26 }
 0x667   :  { %v1857_v40 = vadd.f32 %v3773_v1, %v1816_v49 }
 0x66b   :  { %v1894_v39 = vpop.f32.mrf.mxu0 }
 0x66c   :  { %1975 = vmatmul.f32.gmra.mxu3 %v1765_v53  ;;  %v1895_v53 = vadd.f32 %v1894_v39, %v1854_v3  ;;  %v3828_v39 = vld [vmem:[#allocation11_spill] sm:$0xff] }
 0x66e   :  { %1934 = vmatmul.f32.gmra.mxu1 %v1764_v28 }
 0x673   :  { %v1897_v59 = vpop.f32.mrf.mxu0 }
 0x674   :  { %1978 = vmatmul.f32.gmra.mxu3 %v1769_v8  ;;  %v1898_v61 = vadd.f32 %v1897_v59, %v1857_v40 }
 0x676   :  { %1937 = vmatmul.f32.gmra.mxu1 %v1768_v29 }
 0x6bb   :  { %v1917_v0 = vpop.f32.mrf.mxu1 }
 0x6bc   :  { %v1918_v46 = vadd.f32 %v1917_v0, %v1877_v63 }
 0x6bf   :  { %v1958_v34 = vpop.f32.mrf.mxu3 }
 0x6c0   :  { %v1959_v55 = vadd.f32 %v1958_v34, %v1918_v46 }
 0x6c3   :  { %v1920_v24 = vpop.f32.mrf.mxu1 }
 0x6c4   :  { %v1921_v9 = vadd.f32 %v1920_v24, %v1880_v54  ;;  %v1886_v24 = vadd.f32 %v1885_v35, %v1845_v25 }
 0x6c7   :  { %v1961_v32 = vpop.f32.mrf.mxu3 }
 0x6c8   :  { %v1962_v50 = vadd.f32 %v1961_v32, %v1921_v9 }
 0x6cb   :  { %v1923_v37 = vpop.f32.mrf.mxu1 }
 0x6cc   :  { %v1924_v8 = vadd.f32 %v1923_v37, %v1883_v36 }
 0x6cf   :  { %v1964_v15 = vpop.f32.mrf.mxu3 }
 0x6d0   :  { %v1965_v45 = vadd.f32 %v1964_v15, %v1924_v8 }
 0x6d3   :  { %v1926_v13 = vpop.f32.mrf.mxu1 }
 0x6d4   :  { %v1927_v37 = vadd.f32 %v1926_v13, %v1886_v24 }
 0x6d7   :  { %v1967_v6 = vpop.f32.mrf.mxu3 }
 0x6d8   :  { %v1968_v21 = vadd.f32 %v1967_v6, %v1927_v37  ;;  %v3827_v6 = vld [vmem:[#allocation8_spill] sm:$0xff] }
 0x6db   :  { %v1929_v7 = vpop.f32.mrf.mxu1 }
 0x6dc   :  { %v1930_v51 = vadd.f32 %v1929_v7, %v1889_v41 }
 0x6df   :  { %v1970_v16 = vpop.f32.mrf.mxu3 }
 0x6e0   :  { %v1971_v58 = vadd.f32 %v1970_v16, %v1930_v51  ;;  %v2062_v51 = vsub.f32 %v3827_v6, %v3193_v44 }
 0x6e2   :  { %v1982_v4 = vsub.f32 %v1971_v58, %v1959_v55 }
 0x6e3   :  { %v1932_v56 = vpop.f32.mrf.mxu1 }
 0x6e4   :  { %v2314_v47 = vmul.f32 -1.442695, %v1982_v4  ;;  %v1933_v33 = vadd.f32 %v1932_v56, %v1892_v31 }
 0x6e6   :  { %2479 = vpow2.f32 %v2314_v47 }
 0x6e7   :  { %v1973_v43 = vpop.f32.mrf.mxu3 }
 0x6e8   :  { %v1974_v18 = vadd.f32 %v1973_v43, %v1933_v33  ;;  %v3829_v43 = vld [vmem:[#allocation7_spill] sm:$0xff] }
 0x6ea   :  { %v1983_v17 = vsub.f32 %v1974_v18, %v1962_v50  ;;  %v2063_v50 = vsub.f32 %v3829_v43, %v3828_v39 }
 0x6eb   :  { %v1935_v27 = vpop.f32.mrf.mxu1 }
 0x6ec   :  { %v2480_v10 = vpop.eup %2479  ;;  %v2315_v28 = vmul.f32 -1.442695, %v1983_v17  ;;  %v1936_v29 = vadd.f32 %v1935_v27, %v1895_v53 }
 0x6ed   :  { %v1998_v48 = vadd.f32 1.0, %v2480_v10 }
 0x6ee   :  { %2481 = vpow2.f32 %v2315_v28 }
 0x6ef   :  { %2483 = vrcp.f32 %v1998_v48  ;;  %v1976_v57 = vpop.f32.mrf.mxu3  ;;  %v2013_v1 = vand.u32 2147483648, %v1998_v48  ;;  %v2011_v49 = vand.u32 2147483647, %v1998_v48  ;;  %vm2007_vm3 = vweird.f32 %v1998_v48 }
 0x6f0   :  { %v1977_v2 = vadd.f32 %v1976_v57, %v1936_v29  ;;  %v3830_v29 = vld [vmem:[#allocation10_spill] sm:$0xff] }
 0x6f1   :  { %v2014_v46 = vor.u32 1.1754944e-38, %v2013_v1  ;;  %vm2012_vm5 = vcmp.eq.f32.partialorder %v2011_v49, 8.507059e+37  ;;  %v3831_v57 = vld [vmem:[#allocation6_spill] sm:$0xff] }
 0x6f2   :  { %v1984_v19 = vsub.f32 %v1977_v2, %v1965_v45  ;;  %v2064_v45 = vsub.f32 %v3831_v57, %v3830_v29 }
 0x6f3   :  { %v1938_v0 = vpop.f32.mrf.mxu1 }
 0x6f4   :  { %v2482_v34 = vpop.eup %2481  ;;  %v2316_v32 = vmul.f32 -1.442695, %v1984_v19  ;;  %v1939_v14 = vadd.f32 %v1938_v0, %v1898_v61 }
 0x6f5   :  { %v2484_v52 = vpop.eup %2483  ;;  %v1999_v22 = vadd.f32 1.0, %v2482_v34 }
 0x6f6   :  { %v2003_v12 = vmul.f32 %v2484_v52, %v1998_v48  ;;  %2485 = vpow2.f32 %v2316_v32  ;;  %vm2008_vm2 = vweird.f32 %v2484_v52  ;;  %v3832_v32 = vld [vmem:[#allocation9_spill] sm:$0xff] }
 0x6f7   :  { %2487 = vrcp.f32 %v1999_v22  ;;  %v1979_v15 = vpop.f32.mrf.mxu3  ;;  %vm2009_vm4 = vmor %vm2007_vm3, %vm2008_vm2  ;;  %v2028_v42 = vand.u32 2147483648, %v1999_v22  ;;  %v2026_v38 = vand.u32 2147483647, %v1999_v22  ;;  %vm2022_vm7 = vweird.f32 %v1999_v22 }
 0x6f8   :  { %v1980_v5 = vadd.f32 %v1979_v15, %v1939_v14  ;;  %v2004_v30 = vsub.f32 1.0, %v2003_v12  ;;  %vm2088_vm2 = vcmask 261120  }
 0x6f9   :  { %v2029_v33 = vor.u32 1.1754944e-38, %v2028_v42  ;;  %vm2027_vm9 = vcmp.eq.f32.partialorder %v2026_v38, 8.507059e+37 }
 0x6fa   :  { %v1985_v23 = vsub.f32 %v1980_v5, %v1968_v21  ;;  %v2005_v20 = vmul.f32 %v2484_v52, %v2004_v30  ;;  %v2074_v30 = vld [vmem:[%s3807_s9] sm:$0xff] }
 0x6fc   :  { %v2486_v62 = vpop.eup %2485  ;;  %v2317_v35 = vmul.f32 -1.442695, %v1985_v23  ;;  %v2006_v7 = vadd.f32 %v2484_v52, %v2005_v20  ;;  %v2075_v23 = vld [vmem:[%s3807_s9 + $0x8] sm:$0xff]  ;;  %v2081_v20 = vpop.permute.xlu0 %2080 }
 0x6fd   :  { %v2488_v63 = vpop.eup %2487  ;;  %v2000_v41 = vadd.f32 1.0, %v2486_v62 }
 0x6fe   :  { %v2018_v13 = vmul.f32 %v2488_v63, %v1999_v22  ;;  %2489 = vpow2.f32 %v2317_v35  ;;  %v2010_v60 = vsel %vm2009_vm4, %v2484_v52, %v2006_v7  ;;  %vm2023_vm6 = vweird.f32 %v2488_v63  ;;  %v3833_v52 = vld [vmem:[#allocation5_spill] sm:$0xff] }
 0x6ff   :  { %2491 = vrcp.f32 %v2000_v41  ;;  %v2015_v55 = vsel %vm2012_vm5, %v2014_v46, %v2010_v60  ;;  %vm2024_vm8 = vmor %vm2022_vm7, %vm2023_vm6  ;;  %v2043_v3 = vand.u32 2147483648, %v2000_v41  ;;  %v2041_v10 = vand.u32 2147483647, %v2000_v41 }
 0x700   :  { %v2019_v16 = vsub.f32 1.0, %v2018_v13  ;;  %v2066_v58 = vmul.f32 %v2062_v51, %v2015_v55  ;;  %vm2037_vm11 = vweird.f32 %v2000_v41  ;;  %v2065_v22 = vsub.f32 %v3833_v52, %v3832_v32 }
 0x701   :  { %v2044_v28 = vor.u32 1.1754944e-38, %v2043_v3  ;;  %vm2042_vm13 = vcmp.eq.f32.partialorder %v2041_v10, 8.507059e+37 }
 0x702   :  { %v2020_v11 = vmul.f32 %v2488_v63, %v2019_v16  ;;  %v2070_v5 = vadd.f32 %v2066_v58, %v3193_v44  ;;  %v2086_v44 = vpop.permute.xlu1 %2085 }
 0x704   :  { %v2490_v4 = vpop.eup %2489  ;;  %v2021_v56 = vadd.f32 %v2488_v63, %v2020_v11 }
 0x705   :  { %v2492_v54 = vpop.eup %2491  ;;  %v2001_v31 = vadd.f32 1.0, %v2490_v4 }
 0x706   :  { %v2033_v47 = vmul.f32 %v2492_v54, %v2000_v41  ;;  %v2025_v9 = vsel %vm2024_vm8, %v2488_v63, %v2021_v56  ;;  %vm2038_vm10 = vweird.f32 %v2492_v54 }
 0x707   :  { %2493 = vrcp.f32 %v2001_v31  ;;  %v2030_v26 = vsel %vm2027_vm9, %v2029_v33, %v2025_v9  ;;  %vm2039_vm12 = vmor %vm2037_vm11, %vm2038_vm10  ;;  %v2058_v40 = vand.u32 2147483648, %v2001_v31  ;;  %v2056_v0 = vand.u32 2147483647, %v2001_v31 }
 0x708   :  { %v2034_v18 = vsub.f32 1.0, %v2033_v47  ;;  %v2067_v17 = vmul.f32 %v2063_v50, %v2030_v26  ;;  %vm2052_vm15 = vweird.f32 %v2001_v31 }
 0x709   :  { %v2059_v24 = vor.u32 1.1754944e-38, %v2058_v40  ;;  %vm2057_vm1 = vcmp.eq.f32.partialorder %v2056_v0, 8.507059e+37 }
 0x70a   :  { %v2035_v27 = vmul.f32 %v2492_v54, %v2034_v18  ;;  %v2071_v21 = vadd.f32 %v2067_v17, %v3828_v39 }
 0x70c   :  { %v2036_v36 = vadd.f32 %v2492_v54, %v2035_v27 }
 0x70d   :  { %v2494_v53 = vpop.eup %2493 }
 0x70e   :  { %v2048_v48 = vmul.f32 %v2494_v53, %v2001_v31  ;;  %v2040_v8 = vsel %vm2039_vm12, %v2492_v54, %v2036_v36  ;;  %vm2053_vm14 = vweird.f32 %v2494_v53 }
 0x70f   :  { %v2045_v2 = vsel %vm2042_vm13, %v2044_v28, %v2040_v8  ;;  %vm2054_vm0 = vmor %vm2052_vm15, %vm2053_vm14 }
 0x710   :  { %v2049_v59 = vsub.f32 1.0, %v2048_v48  ;;  %v2068_v25 = vmul.f32 %v2064_v45, %v2045_v2 }
 0x712   :  { %v2050_v19 = vmul.f32 %v2494_v53, %v2049_v59  ;;  %v2072_v15 = vadd.f32 %v2068_v25, %v3830_v29 }
 0x714   :  { %v2051_v34 = vadd.f32 %v2494_v53, %v2050_v19 }
 0x716   :  { %v2055_v61 = vsel %vm2054_vm0, %v2494_v53, %v2051_v34 }
 0x717   :  { %v2060_v37 = vsel %vm2057_vm1, %v2059_v24, %v2055_v61 }
 0x718   :  { %v2069_v12 = vmul.f32 %v2065_v22, %v2060_v37 }
 0x71a   :  { %v2073_v14 = vadd.f32 %v2069_v12, %v3832_v32 }
 0x71c   :  { %2107 = vmatpush.msra.mxu0 %v2073_v14 }
 0x71e   :  { %2108 = vmatpush.msra.mxu0 %v2072_v15 }
 0x720   :  { %2109 = vmatpush.msra.mxu0 %v2071_v21 }
 0x722   :  { %2110 = vmatpush.msra.mxu0 %v2070_v5 }
 0x723   :  { %2318 = vmatmul.msk.f32.vlgmr.msra.gmra.mxu0 %vm2088_vm2, %v2074_v30 }
 0x72b   :  { %2319 = vmatmul.msk.f32.gmra.mxu0 %vm2088_vm2, %v2075_v23 }
 0x7a0   :  { %v2112_v1 = vpop.f32.mrf.mxu0 }
 0x7a1   :  { %v2113_v49 = vadd.f32 %v2112_v1, %v2081_v20 }
 0x7a3   :  { %2118 = vst [vmem:[#allocation2] sm:$0xff] %v2113_v49 }
 0x7a8   :  { %v2115_v62 = vpop.f32.mrf.mxu0 }
 0x7a9   :  { %v2116_v35 = vadd.f32 %v2115_v62, %v2086_v44 }
 0x7ab   :  { %2119 = vst [vmem:[#allocation2 + $0x8] sm:$0xff] %v2116_v35 }
 0x7ac   :  { %2132 = dma.vmem_to_hbm [thread:$0]  %s2125_s18, 256, %s2127_s21, [#allocation3], %s2523_s22, %s2523_s22, %s2524_s23  }
 0x7ad   :  { %2519 = dma.done.wait [#allocation3], 256  }
 0x7ae   :  { %2520 = vsyncadd [#allocation3], 4294967040 }
 0x7af   :  { %2137 = vsyncpa [#allocation3], 1 }

</bundles_post_ra>
